<compile_context>
chip_gen: v7x
topology: tpu7x:2x2x1
jax: 0.10.0
libtpu: 0.0.40
codegen_flags: <defaults>
</compile_context>

<pallas_src>
import math

import jax
import jax.numpy as jnp
from jax.experimental import pallas as pl
from jax.experimental.pallas import tpu as pltpu


_TS = 8  # timesteps fused per grid iteration


def _make_kernel(ts, t_actual, t_pad, n, f, n_pad):
    """Build the fused EvolveGCNH + head kernel for one TS-step chunk."""
    needs_mask = t_pad != t_actual

    def kernel(
        xt_ref,      # [TS, F, F] bf16  pooled node embeddings (GRU inputs)
        x_ref,       # [TS, N, F] bf16  node features
        an_ref,      # [TS, N, N] bf16  pre-normalized adjacency
        h0_ref,      # [F, F]     f32   EvolveGCNH.initial_weight (resident)
        wi_ref,      # [3, F, F]  bf16  input->gate weights, gate axis (r, z, n)
        wh_ref,      # [3, F, F]  bf16  hidden->gate weights, gate axis (r, z, n)
        b_ref,       # [4, F]     f32   bias rows: b_r, b_z, b_in, b_hn (resident)
        wlin_ref,    # [1, F]     f32   final Linear weight row (resident)
        blin_ref,    # [1, 1]     f32   final Linear bias (SMEM scalar)
        out_ref,     # [TS, N_pad] f32  per-chunk predictions, lane-dense
        theta_ref,   # [F, F]     f32   carried evolved weight (constant-index out)
    ):
        # Initialize the carried GRU hidden state from initial_weight on chunk 0;
        # the constant-index output block then stays VMEM-resident for all chunks.
        @pl.when(pl.program_id(0) == 0)
        def _():
            theta_ref[...] = h0_ref[...]

        chunk = pl.program_id(0)
        theta = theta_ref[...]                                  # f32 [F, F]

        # Hoist loop-invariant resident operands out of the unrolled step loop.
        wi_r, wi_z, wi_n = wi_ref[0], wi_ref[1], wi_ref[2]
        wh_r, wh_z, wh_n = wh_ref[0], wh_ref[1], wh_ref[2]
        b_r, b_z = b_ref[0:1, :], b_ref[1:2, :]
        b_in, b_hn = b_ref[2:3, :], b_ref[3:4, :]
        w_row = wlin_ref[...]                                   # f32 [1, F]
        b_lin = blin_ref[0, 0]

        hs = []
        for s in range(ts):                                     # fully unrolled
            h_prev = theta
            hb = h_prev.astype(jnp.bfloat16)
            x_t = xt_ref[s]                                     # bf16 [F, F]

            # ---- one GRU step (torch.nn.GRU); MXU in bf16, state math in f32 ----
            gi_r = jnp.dot(x_t, wi_r, preferred_element_type=jnp.float32)
            gi_z = jnp.dot(x_t, wi_z, preferred_element_type=jnp.float32)
            gi_n = jnp.dot(x_t, wi_n, preferred_element_type=jnp.float32)
            gh_r = jnp.dot(hb, wh_r, preferred_element_type=jnp.float32)
            gh_z = jnp.dot(hb, wh_z, preferred_element_type=jnp.float32)
            gh_n = jnp.dot(hb, wh_n, preferred_element_type=jnp.float32)

            r = jax.nn.sigmoid(gi_r + gh_r + b_r)
            z = jax.nn.sigmoid(gi_z + gh_z + b_z)
            cand = jnp.tanh(gi_n + b_in + r * (gh_n + b_hn))
            theta_new = (1.0 - z) * cand + z * h_prev           # evolved Theta

            if needs_mask:
                # Padded timesteps (beyond the real T) must not advance Theta.
                theta = jnp.where(chunk * ts + s < t_actual, theta_new, h_prev)
            else:
                theta = theta_new

            # ---- GCN conv with pre-normalized adjacency: A_norm @ (X @ Theta) ----
            tb = theta.astype(jnp.bfloat16)
            xw = jnp.dot(x_ref[s], tb, preferred_element_type=jnp.float32)  # [N,F]
            h = jnp.dot(an_ref[s], xw.astype(jnp.bfloat16),
                        preferred_element_type=jnp.float32)                  # [N,F]
            hs.append(jnp.maximum(h, 0.0))                      # ReLU

        theta_ref[...] = theta                                  # carry to next chunk

        # ---- Linear(F -> 1) head for the whole chunk: VPU multiply + lane
        # reduce, then ONE lane-dense [TS, N_pad] store per grid iteration. ----
        h_all = jnp.stack(hs, axis=0)                           # [TS, N, F] f32
        y = jnp.sum(h_all * w_row, axis=-1) + b_lin             # [TS, N]
        if n_pad > n:
            y = jnp.concatenate(
                [y, jnp.zeros((ts, n_pad - n), jnp.float32)], axis=-1)
        out_ref[...] = y

    return kernel


def _preprocess(x, edge_index, edge_weight, w_pool):
    """TopKPooling score/selection + dense normalized adjacency (plain JAX glue)."""
    # TODO(synk): top-k / sort and edge-list scatter-add have no clean Pallas TPU
    # primitive; this preprocessing stays in JAX and fuses in the jitted wrapper.
    N, Fdim = x.shape
    w = w_pool[0]                                        # [F]
    score = jnp.tanh((x @ w) / jnp.linalg.norm(w))       # [N]
    k = Fdim                                             # ratio = F / N -> k == F
    top_score, perm = jax.lax.top_k(score, k)
    x_tilde = x[perm] * top_score[:, None]               # [F, F]

    src, dst = edge_index[0], edge_index[1]
    A = jnp.zeros((N, N), jnp.float32).at[dst, src].add(edge_weight)  # A[target, source]
    A = A + jnp.eye(N, dtype=jnp.float32)                # self loops (fill = 1.0)
    deg = jnp.sum(A, axis=1)                             # deg_i = 1 + sum_j e_{j,i}
    dinv = jax.lax.rsqrt(deg)                            # deg >= 1 with self loops
    a_norm = (dinv[:, None] * A) * dinv[None, :]         # D^-1/2 A_hat D^-1/2
    # Emit the kernel's MXU streams already in compute dtype (halves HBM traffic).
    return x_tilde.astype(jnp.bfloat16), a_norm.astype(jnp.bfloat16)


def recurrent_gcn_forward(xs, edge_index, edge_weight, params, weight=None,
                          chunk_steps=_TS):
    """Forward of RecurrentGCN over T graph snapshots (GRU-carried, TS-chunked).

    xs:          [T, N, F]  (or [N, F] for a single step)
    edge_index:  [T, 2, E]  (or [2, E])
    edge_weight: [T, E]     (or [E], or None)
    weight:      optional [F, F] evolved weight from a previous call (self.weight)
    Returns (out, new_weight): out is [T, N, 1] (or [N, 1] for a single step).
    """
    single = xs.ndim == 2
    if single:
        xs = xs[None]
        edge_index = edge_index[None]
        if edge_weight is not None:
            edge_weight = edge_weight[None]

    xs = xs.astype(jnp.float32)
    T, N, Fdim = xs.shape
    assert N >= Fdim, "TopKPooling ratio F/N needs N >= F (k == F)"

    if edge_weight is None:
        edge_weight = jnp.ones((T, edge_index.shape[-1]), jnp.float32)
    edge_weight = edge_weight.astype(jnp.float32)

    x_tilde, a_norm = jax.vmap(_preprocess, in_axes=(0, 0, 0, None))(
        xs, edge_index, edge_weight, params["pool_weight"])

    TS = int(chunk_steps)
    T_pad = ((T + TS - 1) // TS) * TS
    N_pad = ((N + 127) // 128) * 128
    n_chunks = T_pad // TS

    xs_b = xs.astype(jnp.bfloat16)
    if T_pad > T:
        pad = ((0, T_pad - T), (0, 0), (0, 0))
        x_tilde = jnp.pad(x_tilde, pad)
        xs_b = jnp.pad(xs_b, pad)
        a_norm = jnp.pad(a_norm, pad)

    h0 = (params["initial_weight"] if weight is None else weight).astype(jnp.float32)
    w_i = params["w_i"].astype(jnp.bfloat16)
    w_h = params["w_h"].astype(jnp.bfloat16)

    kernel = _make_kernel(TS, T, T_pad, N, Fdim, N_pad)

    step3 = lambda i: (i, 0, 0)
    const2 = lambda i: (0, 0)
    const3 = lambda i: (0, 0, 0)

    flops = T * (12 * Fdim**3 + 2 * N * Fdim * Fdim + 2 * N * N * Fdim
                 + 2 * N * Fdim + 12 * Fdim * Fdim)
    bytes_accessed = (T_pad * (N * N + N * Fdim + Fdim * Fdim) * 2   # bf16 streams
                      + T_pad * N_pad * 4                            # prediction out
                      + 6 * Fdim * Fdim * 2                          # gate weights
                      + (2 * Fdim * Fdim + 5 * Fdim + 1) * 4)        # f32 params/Theta
    cost = pl.CostEstimate(flops=int(flops),
                           transcendentals=int(T * 3 * Fdim * Fdim),
                           bytes_accessed=int(bytes_accessed))

    out, new_weight = pl.pallas_call(
        kernel,
        grid=(n_chunks,),
        in_specs=[
            pl.BlockSpec((TS, Fdim, Fdim), step3),               # x_tilde chunk
            pl.BlockSpec((TS, N, Fdim), step3),                  # x chunk
            pl.BlockSpec((TS, N, N), step3),                     # A_norm chunk
            pl.BlockSpec((Fdim, Fdim), const2),                  # initial_weight
            pl.BlockSpec((3, Fdim, Fdim), const3),               # gate W_i (r,z,n)
            pl.BlockSpec((3, Fdim, Fdim), const3),               # gate W_h (r,z,n)
            pl.BlockSpec((4, Fdim), const2),                     # bias slab
            pl.BlockSpec((1, Fdim), const2),                     # linear weight row
            pl.BlockSpec(memory_space=pltpu.MemorySpace.SMEM),   # linear bias scalar
        ],
        out_specs=(
            pl.BlockSpec((TS, N_pad), lambda i: (i, 0)),         # lane-dense chunk
            pl.BlockSpec((Fdim, Fdim), const2),                  # carried Theta
        ),
        out_shape=(
            jax.ShapeDtypeStruct((T_pad, N_pad), jnp.float32),
            jax.ShapeDtypeStruct((Fdim, Fdim), jnp.float32),
        ),
        compiler_params=pltpu.CompilerParams(
            dimension_semantics=("arbitrary",),                  # time carries state
            vmem_limit_bytes=32 * 1024 * 1024),
        cost_estimate=cost,
    )(x_tilde, xs_b, a_norm, h0, w_i, w_h,
      params["b_gru"], params["w_lin"], params["b_lin"])

    out = out[:T, :N, None]                                      # [T, N, 1]
    if single:
        return out[0], new_weight
    return out, new_weight


def init_params(key, node_count, node_features):
    F = node_features
    ks = jax.random.split(key, 12)

    def u(k, shape, bound):
        return jax.random.uniform(k, shape, jnp.float32, -bound, bound)

    gru_b = 1.0 / math.sqrt(F)                 # torch GRU default init bound
    glorot_b = math.sqrt(6.0 / (F + F))        # glorot for initial_weight
    lin_b = 1.0 / math.sqrt(F)                 # torch Linear default init bound

    return dict(
        pool_weight=u(ks[0], (1, F), 1.0 / math.sqrt(F)),   # TopKPooling attention
        initial_weight=u(ks[1], (F, F), glorot_b),          # GRU initial hidden
        # Per-gate weights (pre-transposed), leading gate axis ordered (r, z, n):
        w_i=u(ks[2], (3, F, F), gru_b),
        w_h=u(ks[3], (3, F, F), gru_b),
        # Bias slab rows: b_r (= b_ir + b_hr), b_z (= b_iz + b_hz), b_in, b_hn
        b_gru=jnp.concatenate(
            [u(ks[4], (1, F), gru_b) + u(ks[5], (1, F), gru_b),
             u(ks[6], (1, F), gru_b) + u(ks[7], (1, F), gru_b),
             u(ks[8], (1, F), gru_b),
             u(ks[9], (1, F), gru_b)], axis=0),
        w_lin=u(ks[10], (1, F), lin_b),                     # final Linear weight (row)
        b_lin=u(ks[11], (1, 1), lin_b),                     # final Linear bias (SMEM)
    )


if __name__ == "__main__":
    key = jax.random.PRNGKey(0)
    N, F, E, T = 32, 8, 64, 6  # node_count, node_features, edges/step, timesteps

    k_x, k_src, k_dst, k_ew, k_p = jax.random.split(key, 5)
    xs = jax.random.normal(k_x, (T, N, F), jnp.float32)
    src = jax.random.randint(k_src, (T, E), 0, N)
    dst = jax.random.randint(k_dst, (T, E), 0, N)
    edge_index = jnp.stack([src, dst], axis=1).astype(jnp.int32)   # [T, 2, E]
    edge_weight = jax.random.uniform(k_ew, (T, E), jnp.float32, 0.5, 1.5)

    params = init_params(k_p, N, F)

    out, new_weight = jax.jit(recurrent_gcn_forward)(xs, edge_index, edge_weight, params)
    out = jax.block_until_ready(out)

    assert out.shape == (T, N, 1) and out.dtype == jnp.float32
    assert new_weight.shape == (F, F)
    assert bool(jnp.all(jnp.isfinite(out)))
    assert bool(jnp.all(jnp.isfinite(new_weight)))

    # Single-step path (matches one RecurrentGCN.forward call) also works.
    out1, _ = jax.jit(recurrent_gcn_forward)(xs[0], edge_index[0], edge_weight[0], params)
    out1 = jax.block_until_ready(out1)
    assert out1.shape == (N, 1)

    print("KERNEL_OK")
</pallas_src>

<mosaic_0001>
module attributes {stable_mosaic.version = 11 : i64} {
  func.func private @main(%arg0: i32) attributes {dimension_semantics = [#tpu.dimension_semantics<core_parallel>], iteration_bounds = array<i64: 2>, tpu.core_type = #tpu.core_type<sc_scalar_subcore>, window_params = []} {
    return
  }
}

module attributes {stable_mosaic.version = 11 : i64} {
  func.func private @main(%arg0: i32) attributes {dimension_semantics = [#tpu.dimension_semantics<core_parallel>], iteration_bounds = array<i64: 2>, tpu.core_type = #tpu.core_type<sc_scalar_subcore>, window_params = []} {
    return
  }
}

module attributes {stable_mosaic.version = 11 : i64} {
  func.func @kernel(%arg0: i32, %arg1: memref<8x8x8xbf16, #tpu.memory_space<vmem>>, %arg2: memref<8x32x8xbf16, #tpu.memory_space<vmem>>, %arg3: memref<8x32x32xbf16, #tpu.memory_space<vmem>>, %arg4: memref<8x8xf32, #tpu.memory_space<vmem>>, %arg5: memref<3x8x8xbf16, #tpu.memory_space<vmem>>, %arg6: memref<3x8x8xbf16, #tpu.memory_space<vmem>>, %arg7: memref<4x8xf32, #tpu.memory_space<vmem>>, %arg8: memref<1x8xf32, #tpu.memory_space<vmem>>, %arg9: memref<1x1xf32, #tpu.memory_space<smem>>, %arg10: memref<8x128xf32, #tpu.memory_space<vmem>>, %arg11: memref<8x8xf32, #tpu.memory_space<vmem>>) attributes {dimension_semantics = [#tpu.dimension_semantics<arbitrary>], iteration_bounds = array<i64: 1>, scalar_prefetch = 0 : i64, scratch_operands = 0 : i64, tpu.core_type = #tpu.core_type<tc>, window_params = [{transform_indices = @transform_0, window_bounds = array<i64: 8, 8, 8>}, {transform_indices = @transform_1, window_bounds = array<i64: 8, 32, 8>}, {transform_indices = @transform_2, window_bounds = array<i64: 8, 32, 32>}, {pipeline_mode = #tpu.pipeline_mode<synchronous>, transform_indices = @transform_3, window_bounds = array<i64: 8, 8>}, {pipeline_mode = #tpu.pipeline_mode<synchronous>, transform_indices = @transform_4, window_bounds = array<i64: 3, 8, 8>}, {pipeline_mode = #tpu.pipeline_mode<synchronous>, transform_indices = @transform_5, window_bounds = array<i64: 3, 8, 8>}, {pipeline_mode = #tpu.pipeline_mode<synchronous>, transform_indices = @transform_6, window_bounds = array<i64: 4, 8>}, {pipeline_mode = #tpu.pipeline_mode<synchronous>, transform_indices = @transform_7, window_bounds = array<i64: 1, 8>}, {transform_indices = @transform_8, window_bounds = array<i64: 1, 1>}, {transform_indices = @transform_9, window_bounds = array<i64: 8, 128>}, {pipeline_mode = #tpu.pipeline_mode<synchronous>, transform_indices = @transform_10, window_bounds = array<i64: 8, 8>}]} {
    %c0_i32 = arith.constant 0 : i32
    %0 = arith.cmpi eq, %arg0, %c0_i32 : i32
    %1 = arith.extui %0 : i1 to i32
    %c0_i32_0 = arith.constant 0 : i32
    %2 = arith.cmpi ne, %1, %c0_i32_0 : i32
    scf.if %2 {
      %c0_214 = arith.constant 0 : index
      %c0_215 = arith.constant 0 : index
      %449 = vector.load %arg4[%c0_214, %c0_215] : memref<8x8xf32, #tpu.memory_space<vmem>>, vector<8x8xf32>
      %c0_216 = arith.constant 0 : index
      %c0_217 = arith.constant 0 : index
      %450 = vector.load %arg11[%c0_216, %c0_217] : memref<8x8xf32, #tpu.memory_space<vmem>>, vector<8x8xf32>
      tpu.vector_store %arg11[%c0_216, %c0_217], %449 {strides = array<i32>} : memref<8x8xf32, #tpu.memory_space<vmem>>, vector<8x8xf32>,
    } else {
    }
    %c0 = arith.constant 0 : index
    %c0_1 = arith.constant 0 : index
    %3 = vector.load %arg11[%c0, %c0_1] : memref<8x8xf32, #tpu.memory_space<vmem>>, vector<8x8xf32>
    %c0_2 = arith.constant 0 : index
    %c0_3 = arith.constant 0 : index
    %c0_4 = arith.constant 0 : index
    %4 = vector.load %arg5[%c0_2, %c0_3, %c0_4] : memref<3x8x8xbf16, #tpu.memory_space<vmem>>, vector<1x8x8xbf16>
    %5 = vector.shape_cast %4 : vector<1x8x8xbf16> to vector<8x8xbf16>
    %c1 = arith.constant 1 : index
    %c0_5 = arith.constant 0 : index
    %c0_6 = arith.constant 0 : index
    %6 = vector.load %arg5[%c1, %c0_5, %c0_6] : memref<3x8x8xbf16, #tpu.memory_space<vmem>>, vector<1x8x8xbf16>
    %7 = vector.shape_cast %6 : vector<1x8x8xbf16> to vector<8x8xbf16>
    %c2 = arith.constant 2 : index
    %c0_7 = arith.constant 0 : index
    %c0_8 = arith.constant 0 : index
    %8 = vector.load %arg5[%c2, %c0_7, %c0_8] : memref<3x8x8xbf16, #tpu.memory_space<vmem>>, vector<1x8x8xbf16>
    %9 = vector.shape_cast %8 : vector<1x8x8xbf16> to vector<8x8xbf16>
    %c0_9 = arith.constant 0 : index
    %c0_10 = arith.constant 0 : index
    %c0_11 = arith.constant 0 : index
    %10 = vector.load %arg6[%c0_9, %c0_10, %c0_11] : memref<3x8x8xbf16, #tpu.memory_space<vmem>>, vector<1x8x8xbf16>
    %11 = vector.shape_cast %10 : vector<1x8x8xbf16> to vector<8x8xbf16>
    %c1_12 = arith.constant 1 : index
    %c0_13 = arith.constant 0 : index
    %c0_14 = arith.constant 0 : index
    %12 = vector.load %arg6[%c1_12, %c0_13, %c0_14] : memref<3x8x8xbf16, #tpu.memory_space<vmem>>, vector<1x8x8xbf16>
    %13 = vector.shape_cast %12 : vector<1x8x8xbf16> to vector<8x8xbf16>
    %c2_15 = arith.constant 2 : index
    %c0_16 = arith.constant 0 : index
    %c0_17 = arith.constant 0 : index
    %14 = vector.load %arg6[%c2_15, %c0_16, %c0_17] : memref<3x8x8xbf16, #tpu.memory_space<vmem>>, vector<1x8x8xbf16>
    %15 = vector.shape_cast %14 : vector<1x8x8xbf16> to vector<8x8xbf16>
    %c0_18 = arith.constant 0 : index
    %c0_19 = arith.constant 0 : index
    %16 = vector.load %arg7[%c0_18, %c0_19] : memref<4x8xf32, #tpu.memory_space<vmem>>, vector<1x8xf32>
    %c1_20 = arith.constant 1 : index
    %c0_21 = arith.constant 0 : index
    %17 = vector.load %arg7[%c1_20, %c0_21] : memref<4x8xf32, #tpu.memory_space<vmem>>, vector<1x8xf32>
    %c2_22 = arith.constant 2 : index
    %c0_23 = arith.constant 0 : index
    %18 = vector.load %arg7[%c2_22, %c0_23] : memref<4x8xf32, #tpu.memory_space<vmem>>, vector<1x8xf32>
    %c3 = arith.constant 3 : index
    %c0_24 = arith.constant 0 : index
    %19 = vector.load %arg7[%c3, %c0_24] : memref<4x8xf32, #tpu.memory_space<vmem>>, vector<1x8xf32>
    %c0_25 = arith.constant 0 : index
    %c0_26 = arith.constant 0 : index
    %20 = vector.load %arg8[%c0_25, %c0_26] : memref<1x8xf32, #tpu.memory_space<vmem>>, vector<1x8xf32>
    %c0_27 = arith.constant 0 : index
    %c0_28 = arith.constant 0 : index
    %21 = memref.load %arg9[%c0_27, %c0_28] : memref<1x1xf32, #tpu.memory_space<smem>>
    %22 = arith.truncf %3 : vector<8x8xf32> to vector<8x8xbf16>
    %c0_29 = arith.constant 0 : index
    %c0_30 = arith.constant 0 : index
    %c0_31 = arith.constant 0 : index
    %23 = vector.load %arg1[%c0_29, %c0_30, %c0_31] : memref<8x8x8xbf16, #tpu.memory_space<vmem>>, vector<1x8x8xbf16>
    %24 = vector.shape_cast %23 : vector<1x8x8xbf16> to vector<8x8xbf16>
    %cst = arith.constant dense<0.000000e+00> : vector<8x8xf32>
    %25 = tpu.matmul %24, %5, %cst {dimension_numbers = #tpu.dot_dimension_numbers<[1], [0], [0], [1], [0, 0, 1, 1], [], []>} : vector<8x8xbf16>, vector<8x8xbf16>, vector<8x8xf32> -> vector<8x8xf32>
    %cst_32 = arith.constant dense<0.000000e+00> : vector<8x8xf32>
    %26 = tpu.matmul %24, %7, %cst_32 {dimension_numbers = #tpu.dot_dimension_numbers<[1], [0], [0], [1], [0, 0, 1, 1], [], []>} : vector<8x8xbf16>, vector<8x8xbf16>, vector<8x8xf32> -> vector<8x8xf32>
    %cst_33 = arith.constant dense<0.000000e+00> : vector<8x8xf32>
    %27 = tpu.matmul %24, %9, %cst_33 {dimension_numbers = #tpu.dot_dimension_numbers<[1], [0], [0], [1], [0, 0, 1, 1], [], []>} : vector<8x8xbf16>, vector<8x8xbf16>, vector<8x8xf32> -> vector<8x8xf32>
    %cst_34 = arith.constant dense<0.000000e+00> : vector<8x8xf32>
    %28 = tpu.matmul %22, %11, %cst_34 {dimension_numbers = #tpu.dot_dimension_numbers<[1], [0], [0], [1], [0, 0, 1, 1], [], []>} : vector<8x8xbf16>, vector<8x8xbf16>, vector<8x8xf32> -> vector<8x8xf32>
    %cst_35 = arith.constant dense<0.000000e+00> : vector<8x8xf32>
    %29 = tpu.matmul %22, %13, %cst_35 {dimension_numbers = #tpu.dot_dimension_numbers<[1], [0], [0], [1], [0, 0, 1, 1], [], []>} : vector<8x8xbf16>, vector<8x8xbf16>, vector<8x8xf32> -> vector<8x8xf32>
    %cst_36 = arith.constant dense<0.000000e+00> : vector<8x8xf32>
    %30 = tpu.matmul %22, %15, %cst_36 {dimension_numbers = #tpu.dot_dimension_numbers<[1], [0], [0], [1], [0, 0, 1, 1], [], []>} : vector<8x8xbf16>, vector<8x8xbf16>, vector<8x8xf32> -> vector<8x8xf32>
    %31 = arith.addf %25, %28 : vector<8x8xf32>
    %32 = vector.broadcast %16 : vector<1x8xf32> to vector<8x8xf32>
    %33 = arith.addf %31, %32 : vector<8x8xf32>
    %34 = arith.negf %33 : vector<8x8xf32>
    %35 = math.exp %34 : vector<8x8xf32>
    %cst_37 = arith.constant 1.000000e+00 : f32
    %36 = vector.broadcast %cst_37 : f32 to vector<8x8xf32>
    %37 = arith.addf %36, %35 : vector<8x8xf32>
    %38 = arith.divf %36, %37 : vector<8x8xf32>
    %39 = arith.addf %26, %29 : vector<8x8xf32>
    %40 = vector.broadcast %17 : vector<1x8xf32> to vector<8x8xf32>
    %41 = arith.addf %39, %40 : vector<8x8xf32>
    %42 = arith.negf %41 : vector<8x8xf32>
    %43 = math.exp %42 : vector<8x8xf32>
    %cst_38 = arith.constant 1.000000e+00 : f32
    %44 = vector.broadcast %cst_38 : f32 to vector<8x8xf32>
    %45 = arith.addf %44, %43 : vector<8x8xf32>
    %46 = arith.divf %44, %45 : vector<8x8xf32>
    %47 = vector.broadcast %18 : vector<1x8xf32> to vector<8x8xf32>
    %48 = arith.addf %27, %47 : vector<8x8xf32>
    %49 = vector.broadcast %19 : vector<1x8xf32> to vector<8x8xf32>
    %50 = arith.addf %30, %49 : vector<8x8xf32>
    %51 = arith.mulf %38, %50 : vector<8x8xf32>
    %52 = arith.addf %48, %51 : vector<8x8xf32>
    %53 = math.tanh %52 : vector<8x8xf32>
    %cst_39 = arith.constant 1.000000e+00 : f32
    %54 = vector.broadcast %cst_39 : f32 to vector<8x8xf32>
    %55 = arith.subf %54, %46 : vector<8x8xf32>
    %56 = arith.mulf %55, %53 : vector<8x8xf32>
    %57 = arith.mulf %46, %3 : vector<8x8xf32>
    %58 = arith.addf %56, %57 : vector<8x8xf32>
    %c8_i32 = arith.constant 8 : i32
    %59 = arith.muli %arg0, %c8_i32 : i32
    %c0_i32_40 = arith.constant 0 : i32
    %60 = arith.addi %59, %c0_i32_40 : i32
    %c6_i32 = arith.constant 6 : i32
    %61 = arith.cmpi slt, %60, %c6_i32 : i32
    %62 = arith.select %61, %58, %3 : vector<8x8xf32>
    %63 = arith.truncf %62 : vector<8x8xf32> to vector<8x8xbf16>
    %c0_41 = arith.constant 0 : index
    %c0_42 = arith.constant 0 : index
    %c0_43 = arith.constant 0 : index
    %64 = vector.load %arg2[%c0_41, %c0_42, %c0_43] : memref<8x32x8xbf16, #tpu.memory_space<vmem>>, vector<1x32x8xbf16>
    %65 = vector.shape_cast %64 : vector<1x32x8xbf16> to vector<32x8xbf16>
    %cst_44 = arith.constant dense<0.000000e+00> : vector<32x8xf32>
    %66 = tpu.matmul %65, %63, %cst_44 {dimension_numbers = #tpu.dot_dimension_numbers<[1], [0], [0], [1], [0, 0, 1, 1], [], []>} : vector<32x8xbf16>, vector<8x8xbf16>, vector<32x8xf32> -> vector<32x8xf32>
    %c0_45 = arith.constant 0 : index
    %c0_46 = arith.constant 0 : index
    %c0_47 = arith.constant 0 : index
    %67 = vector.load %arg3[%c0_45, %c0_46, %c0_47] : memref<8x32x32xbf16, #tpu.memory_space<vmem>>, vector<1x32x32xbf16>
    %68 = vector.shape_cast %67 : vector<1x32x32xbf16> to vector<32x32xbf16>
    %69 = arith.truncf %66 : vector<32x8xf32> to vector<32x8xbf16>
    %cst_48 = arith.constant dense<0.000000e+00> : vector<32x8xf32>
    %70 = tpu.matmul %68, %69, %cst_48 {dimension_numbers = #tpu.dot_dimension_numbers<[1], [0], [0], [1], [0, 0, 1, 1], [], []>} : vector<32x32xbf16>, vector<32x8xbf16>, vector<32x8xf32> -> vector<32x8xf32>
    %cst_49 = arith.constant 0.000000e+00 : f32
    %71 = vector.broadcast %cst_49 : f32 to vector<32x8xf32>
    %72 = arith.maximumf %70, %71 : vector<32x8xf32>
    %73 = arith.truncf %62 : vector<8x8xf32> to vector<8x8xbf16>
    %c1_50 = arith.constant 1 : index
    %c0_51 = arith.constant 0 : index
    %c0_52 = arith.constant 0 : index
    %74 = vector.load %arg1[%c1_50, %c0_51, %c0_52] : memref<8x8x8xbf16, #tpu.memory_space<vmem>>, vector<1x8x8xbf16>
    %75 = vector.shape_cast %74 : vector<1x8x8xbf16> to vector<8x8xbf16>
    %cst_53 = arith.constant dense<0.000000e+00> : vector<8x8xf32>
    %76 = tpu.matmul %75, %5, %cst_53 {dimension_numbers = #tpu.dot_dimension_numbers<[1], [0], [0], [1], [0, 0, 1, 1], [], []>} : vector<8x8xbf16>, vector<8x8xbf16>, vector<8x8xf32> -> vector<8x8xf32>
    %cst_54 = arith.constant dense<0.000000e+00> : vector<8x8xf32>
    %77 = tpu.matmul %75, %7, %cst_54 {dimension_numbers = #tpu.dot_dimension_numbers<[1], [0], [0], [1], [0, 0, 1, 1], [], []>} : vector<8x8xbf16>, vector<8x8xbf16>, vector<8x8xf32> -> vector<8x8xf32>
    %cst_55 = arith.constant dense<0.000000e+00> : vector<8x8xf32>
    %78 = tpu.matmul %75, %9, %cst_55 {dimension_numbers = #tpu.dot_dimension_numbers<[1], [0], [0], [1], [0, 0, 1, 1], [], []>} : vector<8x8xbf16>, vector<8x8xbf16>, vector<8x8xf32> -> vector<8x8xf32>
    %cst_56 = arith.constant dense<0.000000e+00> : vector<8x8xf32>
    %79 = tpu.matmul %73, %11, %cst_56 {dimension_numbers = #tpu.dot_dimension_numbers<[1], [0], [0], [1], [0, 0, 1, 1], [], []>} : vector<8x8xbf16>, vector<8x8xbf16>, vector<8x8xf32> -> vector<8x8xf32>
    %cst_57 = arith.constant dense<0.000000e+00> : vector<8x8xf32>
    %80 = tpu.matmul %73, %13, %cst_57 {dimension_numbers = #tpu.dot_dimension_numbers<[1], [0], [0], [1], [0, 0, 1, 1], [], []>} : vector<8x8xbf16>, vector<8x8xbf16>, vector<8x8xf32> -> vector<8x8xf32>
    %cst_58 = arith.constant dense<0.000000e+00> : vector<8x8xf32>
    %81 = tpu.matmul %73, %15, %cst_58 {dimension_numbers = #tpu.dot_dimension_numbers<[1], [0], [0], [1], [0, 0, 1, 1], [], []>} : vector<8x8xbf16>, vector<8x8xbf16>, vector<8x8xf32> -> vector<8x8xf32>
    %82 = arith.addf %76, %79 : vector<8x8xf32>
    %83 = vector.broadcast %16 : vector<1x8xf32> to vector<8x8xf32>
    %84 = arith.addf %82, %83 : vector<8x8xf32>
    %85 = arith.negf %84 : vector<8x8xf32>
    %86 = math.exp %85 : vector<8x8xf32>
    %cst_59 = arith.constant 1.000000e+00 : f32
    %87 = vector.broadcast %cst_59 : f32 to vector<8x8xf32>
    %88 = arith.addf %87, %86 : vector<8x8xf32>
    %89 = arith.divf %87, %88 : vector<8x8xf32>
    %90 = arith.addf %77, %80 : vector<8x8xf32>
    %91 = vector.broadcast %17 : vector<1x8xf32> to vector<8x8xf32>
    %92 = arith.addf %90, %91 : vector<8x8xf32>
    %93 = arith.negf %92 : vector<8x8xf32>
    %94 = math.exp %93 : vector<8x8xf32>
    %cst_60 = arith.constant 1.000000e+00 : f32
    %95 = vector.broadcast %cst_60 : f32 to vector<8x8xf32>
    %96 = arith.addf %95, %94 : vector<8x8xf32>
    %97 = arith.divf %95, %96 : vector<8x8xf32>
    %98 = vector.broadcast %18 : vector<1x8xf32> to vector<8x8xf32>
    %99 = arith.addf %78, %98 : vector<8x8xf32>
    %100 = vector.broadcast %19 : vector<1x8xf32> to vector<8x8xf32>
    %101 = arith.addf %81, %100 : vector<8x8xf32>
    %102 = arith.mulf %89, %101 : vector<8x8xf32>
    %103 = arith.addf %99, %102 : vector<8x8xf32>
    %104 = math.tanh %103 : vector<8x8xf32>
    %cst_61 = arith.constant 1.000000e+00 : f32
    %105 = vector.broadcast %cst_61 : f32 to vector<8x8xf32>
    %106 = arith.subf %105, %97 : vector<8x8xf32>
    %107 = arith.mulf %106, %104 : vector<8x8xf32>
    %108 = arith.mulf %97, %62 : vector<8x8xf32>
    %109 = arith.addf %107, %108 : vector<8x8xf32>
    %c8_i32_62 = arith.constant 8 : i32
    %110 = arith.muli %arg0, %c8_i32_62 : i32
    %c1_i32 = arith.constant 1 : i32
    %111 = arith.addi %110, %c1_i32 : i32
    %c6_i32_63 = arith.constant 6 : i32
    %112 = arith.cmpi slt, %111, %c6_i32_63 : i32
    %113 = arith.select %112, %109, %62 : vector<8x8xf32>
    %114 = arith.truncf %113 : vector<8x8xf32> to vector<8x8xbf16>
    %c1_64 = arith.constant 1 : index
    %c0_65 = arith.constant 0 : index
    %c0_66 = arith.constant 0 : index
    %115 = vector.load %arg2[%c1_64, %c0_65, %c0_66] : memref<8x32x8xbf16, #tpu.memory_space<vmem>>, vector<1x32x8xbf16>
    %116 = vector.shape_cast %115 : vector<1x32x8xbf16> to vector<32x8xbf16>
    %cst_67 = arith.constant dense<0.000000e+00> : vector<32x8xf32>
    %117 = tpu.matmul %116, %114, %cst_67 {dimension_numbers = #tpu.dot_dimension_numbers<[1], [0], [0], [1], [0, 0, 1, 1], [], []>} : vector<32x8xbf16>, vector<8x8xbf16>, vector<32x8xf32> -> vector<32x8xf32>
    %c1_68 = arith.constant 1 : index
    %c0_69 = arith.constant 0 : index
    %c0_70 = arith.constant 0 : index
    %118 = vector.load %arg3[%c1_68, %c0_69, %c0_70] : memref<8x32x32xbf16, #tpu.memory_space<vmem>>, vector<1x32x32xbf16>
    %119 = vector.shape_cast %118 : vector<1x32x32xbf16> to vector<32x32xbf16>
    %120 = arith.truncf %117 : vector<32x8xf32> to vector<32x8xbf16>
    %cst_71 = arith.constant dense<0.000000e+00> : vector<32x8xf32>
    %121 = tpu.matmul %119, %120, %cst_71 {dimension_numbers = #tpu.dot_dimension_numbers<[1], [0], [0], [1], [0, 0, 1, 1], [], []>} : vector<32x32xbf16>, vector<32x8xbf16>, vector<32x8xf32> -> vector<32x8xf32>
    %cst_72 = arith.constant 0.000000e+00 : f32
    %122 = vector.broadcast %cst_72 : f32 to vector<32x8xf32>
    %123 = arith.maximumf %121, %122 : vector<32x8xf32>
    %124 = arith.truncf %113 : vector<8x8xf32> to vector<8x8xbf16>
    %c2_73 = arith.constant 2 : index
    %c0_74 = arith.constant 0 : index
    %c0_75 = arith.constant 0 : index
    %125 = vector.load %arg1[%c2_73, %c0_74, %c0_75] : memref<8x8x8xbf16, #tpu.memory_space<vmem>>, vector<1x8x8xbf16>
    %126 = vector.shape_cast %125 : vector<1x8x8xbf16> to vector<8x8xbf16>
    %cst_76 = arith.constant dense<0.000000e+00> : vector<8x8xf32>
    %127 = tpu.matmul %126, %5, %cst_76 {dimension_numbers = #tpu.dot_dimension_numbers<[1], [0], [0], [1], [0, 0, 1, 1], [], []>} : vector<8x8xbf16>, vector<8x8xbf16>, vector<8x8xf32> -> vector<8x8xf32>
    %cst_77 = arith.constant dense<0.000000e+00> : vector<8x8xf32>
    %128 = tpu.matmul %126, %7, %cst_77 {dimension_numbers = #tpu.dot_dimension_numbers<[1], [0], [0], [1], [0, 0, 1, 1], [], []>} : vector<8x8xbf16>, vector<8x8xbf16>, vector<8x8xf32> -> vector<8x8xf32>
    %cst_78 = arith.constant dense<0.000000e+00> : vector<8x8xf32>
    %129 = tpu.matmul %126, %9, %cst_78 {dimension_numbers = #tpu.dot_dimension_numbers<[1], [0], [0], [1], [0, 0, 1, 1], [], []>} : vector<8x8xbf16>, vector<8x8xbf16>, vector<8x8xf32> -> vector<8x8xf32>
    %cst_79 = arith.constant dense<0.000000e+00> : vector<8x8xf32>
    %130 = tpu.matmul %124, %11, %cst_79 {dimension_numbers = #tpu.dot_dimension_numbers<[1], [0], [0], [1], [0, 0, 1, 1], [], []>} : vector<8x8xbf16>, vector<8x8xbf16>, vector<8x8xf32> -> vector<8x8xf32>
    %cst_80 = arith.constant dense<0.000000e+00> : vector<8x8xf32>
    %131 = tpu.matmul %124, %13, %cst_80 {dimension_numbers = #tpu.dot_dimension_numbers<[1], [0], [0], [1], [0, 0, 1, 1], [], []>} : vector<8x8xbf16>, vector<8x8xbf16>, vector<8x8xf32> -> vector<8x8xf32>
    %cst_81 = arith.constant dense<0.000000e+00> : vector<8x8xf32>
    %132 = tpu.matmul %124, %15, %cst_81 {dimension_numbers = #tpu.dot_dimension_numbers<[1], [0], [0], [1], [0, 0, 1, 1], [], []>} : vector<8x8xbf16>, vector<8x8xbf16>, vector<8x8xf32> -> vector<8x8xf32>
    %133 = arith.addf %127, %130 : vector<8x8xf32>
    %134 = vector.broadcast %16 : vector<1x8xf32> to vector<8x8xf32>
    %135 = arith.addf %133, %134 : vector<8x8xf32>
    %136 = arith.negf %135 : vector<8x8xf32>
    %137 = math.exp %136 : vector<8x8xf32>
    %cst_82 = arith.constant 1.000000e+00 : f32
    %138 = vector.broadcast %cst_82 : f32 to vector<8x8xf32>
    %139 = arith.addf %138, %137 : vector<8x8xf32>
    %140 = arith.divf %138, %139 : vector<8x8xf32>
    %141 = arith.addf %128, %131 : vector<8x8xf32>
    %142 = vector.broadcast %17 : vector<1x8xf32> to vector<8x8xf32>
    %143 = arith.addf %141, %142 : vector<8x8xf32>
    %144 = arith.negf %143 : vector<8x8xf32>
    %145 = math.exp %144 : vector<8x8xf32>
    %cst_83 = arith.constant 1.000000e+00 : f32
    %146 = vector.broadcast %cst_83 : f32 to vector<8x8xf32>
    %147 = arith.addf %146, %145 : vector<8x8xf32>
    %148 = arith.divf %146, %147 : vector<8x8xf32>
    %149 = vector.broadcast %18 : vector<1x8xf32> to vector<8x8xf32>
    %150 = arith.addf %129, %149 : vector<8x8xf32>
    %151 = vector.broadcast %19 : vector<1x8xf32> to vector<8x8xf32>
    %152 = arith.addf %132, %151 : vector<8x8xf32>
    %153 = arith.mulf %140, %152 : vector<8x8xf32>
    %154 = arith.addf %150, %153 : vector<8x8xf32>
    %155 = math.tanh %154 : vector<8x8xf32>
    %cst_84 = arith.constant 1.000000e+00 : f32
    %156 = vector.broadcast %cst_84 : f32 to vector<8x8xf32>
    %157 = arith.subf %156, %148 : vector<8x8xf32>
    %158 = arith.mulf %157, %155 : vector<8x8xf32>
    %159 = arith.mulf %148, %113 : vector<8x8xf32>
    %160 = arith.addf %158, %159 : vector<8x8xf32>
    %c8_i32_85 = arith.constant 8 : i32
    %161 = arith.muli %arg0, %c8_i32_85 : i32
    %c2_i32 = arith.constant 2 : i32
    %162 = arith.addi %161, %c2_i32 : i32
    %c6_i32_86 = arith.constant 6 : i32
    %163 = arith.cmpi slt, %162, %c6_i32_86 : i32
    %164 = arith.select %163, %160, %113 : vector<8x8xf32>
    %165 = arith.truncf %164 : vector<8x8xf32> to vector<8x8xbf16>
    %c2_87 = arith.constant 2 : index
    %c0_88 = arith.constant 0 : index
    %c0_89 = arith.constant 0 : index
    %166 = vector.load %arg2[%c2_87, %c0_88, %c0_89] : memref<8x32x8xbf16, #tpu.memory_space<vmem>>, vector<1x32x8xbf16>
    %167 = vector.shape_cast %166 : vector<1x32x8xbf16> to vector<32x8xbf16>
    %cst_90 = arith.constant dense<0.000000e+00> : vector<32x8xf32>
    %168 = tpu.matmul %167, %165, %cst_90 {dimension_numbers = #tpu.dot_dimension_numbers<[1], [0], [0], [1], [0, 0, 1, 1], [], []>} : vector<32x8xbf16>, vector<8x8xbf16>, vector<32x8xf32> -> vector<32x8xf32>
    %c2_91 = arith.constant 2 : index
    %c0_92 = arith.constant 0 : index
    %c0_93 = arith.constant 0 : index
    %169 = vector.load %arg3[%c2_91, %c0_92, %c0_93] : memref<8x32x32xbf16, #tpu.memory_space<vmem>>, vector<1x32x32xbf16>
    %170 = vector.shape_cast %169 : vector<1x32x32xbf16> to vector<32x32xbf16>
    %171 = arith.truncf %168 : vector<32x8xf32> to vector<32x8xbf16>
    %cst_94 = arith.constant dense<0.000000e+00> : vector<32x8xf32>
    %172 = tpu.matmul %170, %171, %cst_94 {dimension_numbers = #tpu.dot_dimension_numbers<[1], [0], [0], [1], [0, 0, 1, 1], [], []>} : vector<32x32xbf16>, vector<32x8xbf16>, vector<32x8xf32> -> vector<32x8xf32>
    %cst_95 = arith.constant 0.000000e+00 : f32
    %173 = vector.broadcast %cst_95 : f32 to vector<32x8xf32>
    %174 = arith.maximumf %172, %173 : vector<32x8xf32>
    %175 = arith.truncf %164 : vector<8x8xf32> to vector<8x8xbf16>
    %c3_96 = arith.constant 3 : index
    %c0_97 = arith.constant 0 : index
    %c0_98 = arith.constant 0 : index
    %176 = vector.load %arg1[%c3_96, %c0_97, %c0_98] : memref<8x8x8xbf16, #tpu.memory_space<vmem>>, vector<1x8x8xbf16>
    %177 = vector.shape_cast %176 : vector<1x8x8xbf16> to vector<8x8xbf16>
    %cst_99 = arith.constant dense<0.000000e+00> : vector<8x8xf32>
    %178 = tpu.matmul %177, %5, %cst_99 {dimension_numbers = #tpu.dot_dimension_numbers<[1], [0], [0], [1], [0, 0, 1, 1], [], []>} : vector<8x8xbf16>, vector<8x8xbf16>, vector<8x8xf32> -> vector<8x8xf32>
    %cst_100 = arith.constant dense<0.000000e+00> : vector<8x8xf32>
    %179 = tpu.matmul %177, %7, %cst_100 {dimension_numbers = #tpu.dot_dimension_numbers<[1], [0], [0], [1], [0, 0, 1, 1], [], []>} : vector<8x8xbf16>, vector<8x8xbf16>, vector<8x8xf32> -> vector<8x8xf32>
    %cst_101 = arith.constant dense<0.000000e+00> : vector<8x8xf32>
    %180 = tpu.matmul %177, %9, %cst_101 {dimension_numbers = #tpu.dot_dimension_numbers<[1], [0], [0], [1], [0, 0, 1, 1], [], []>} : vector<8x8xbf16>, vector<8x8xbf16>, vector<8x8xf32> -> vector<8x8xf32>
    %cst_102 = arith.constant dense<0.000000e+00> : vector<8x8xf32>
    %181 = tpu.matmul %175, %11, %cst_102 {dimension_numbers = #tpu.dot_dimension_numbers<[1], [0], [0], [1], [0, 0, 1, 1], [], []>} : vector<8x8xbf16>, vector<8x8xbf16>, vector<8x8xf32> -> vector<8x8xf32>
    %cst_103 = arith.constant dense<0.000000e+00> : vector<8x8xf32>
    %182 = tpu.matmul %175, %13, %cst_103 {dimension_numbers = #tpu.dot_dimension_numbers<[1], [0], [0], [1], [0, 0, 1, 1], [], []>} : vector<8x8xbf16>, vector<8x8xbf16>, vector<8x8xf32> -> vector<8x8xf32>
    %cst_104 = arith.constant dense<0.000000e+00> : vector<8x8xf32>
    %183 = tpu.matmul %175, %15, %cst_104 {dimension_numbers = #tpu.dot_dimension_numbers<[1], [0], [0], [1], [0, 0, 1, 1], [], []>} : vector<8x8xbf16>, vector<8x8xbf16>, vector<8x8xf32> -> vector<8x8xf32>
    %184 = arith.addf %178, %181 : vector<8x8xf32>
    %185 = vector.broadcast %16 : vector<1x8xf32> to vector<8x8xf32>
    %186 = arith.addf %184, %185 : vector<8x8xf32>
    %187 = arith.negf %186 : vector<8x8xf32>
    %188 = math.exp %187 : vector<8x8xf32>
    %cst_105 = arith.constant 1.000000e+00 : f32
    %189 = vector.broadcast %cst_105 : f32 to vector<8x8xf32>
    %190 = arith.addf %189, %188 : vector<8x8xf32>
    %191 = arith.divf %189, %190 : vector<8x8xf32>
    %192 = arith.addf %179, %182 : vector<8x8xf32>
    %193 = vector.broadcast %17 : vector<1x8xf32> to vector<8x8xf32>
    %194 = arith.addf %192, %193 : vector<8x8xf32>
    %195 = arith.negf %194 : vector<8x8xf32>
    %196 = math.exp %195 : vector<8x8xf32>
    %cst_106 = arith.constant 1.000000e+00 : f32
    %197 = vector.broadcast %cst_106 : f32 to vector<8x8xf32>
    %198 = arith.addf %197, %196 : vector<8x8xf32>
    %199 = arith.divf %197, %198 : vector<8x8xf32>
    %200 = vector.broadcast %18 : vector<1x8xf32> to vector<8x8xf32>
    %201 = arith.addf %180, %200 : vector<8x8xf32>
    %202 = vector.broadcast %19 : vector<1x8xf32> to vector<8x8xf32>
    %203 = arith.addf %183, %202 : vector<8x8xf32>
    %204 = arith.mulf %191, %203 : vector<8x8xf32>
    %205 = arith.addf %201, %204 : vector<8x8xf32>
    %206 = math.tanh %205 : vector<8x8xf32>
    %cst_107 = arith.constant 1.000000e+00 : f32
    %207 = vector.broadcast %cst_107 : f32 to vector<8x8xf32>
    %208 = arith.subf %207, %199 : vector<8x8xf32>
    %209 = arith.mulf %208, %206 : vector<8x8xf32>
    %210 = arith.mulf %199, %164 : vector<8x8xf32>
    %211 = arith.addf %209, %210 : vector<8x8xf32>
    %c8_i32_108 = arith.constant 8 : i32
    %212 = arith.muli %arg0, %c8_i32_108 : i32
    %c3_i32 = arith.constant 3 : i32
    %213 = arith.addi %212, %c3_i32 : i32
    %c6_i32_109 = arith.constant 6 : i32
    %214 = arith.cmpi slt, %213, %c6_i32_109 : i32
    %215 = arith.select %214, %211, %164 : vector<8x8xf32>
    %216 = arith.truncf %215 : vector<8x8xf32> to vector<8x8xbf16>
    %c3_110 = arith.constant 3 : index
    %c0_111 = arith.constant 0 : index
    %c0_112 = arith.constant 0 : index
    %217 = vector.load %arg2[%c3_110, %c0_111, %c0_112] : memref<8x32x8xbf16, #tpu.memory_space<vmem>>, vector<1x32x8xbf16>
    %218 = vector.shape_cast %217 : vector<1x32x8xbf16> to vector<32x8xbf16>
    %cst_113 = arith.constant dense<0.000000e+00> : vector<32x8xf32>
    %219 = tpu.matmul %218, %216, %cst_113 {dimension_numbers = #tpu.dot_dimension_numbers<[1], [0], [0], [1], [0, 0, 1, 1], [], []>} : vector<32x8xbf16>, vector<8x8xbf16>, vector<32x8xf32> -> vector<32x8xf32>
    %c3_114 = arith.constant 3 : index
    %c0_115 = arith.constant 0 : index
    %c0_116 = arith.constant 0 : index
    %220 = vector.load %arg3[%c3_114, %c0_115, %c0_116] : memref<8x32x32xbf16, #tpu.memory_space<vmem>>, vector<1x32x32xbf16>
    %221 = vector.shape_cast %220 : vector<1x32x32xbf16> to vector<32x32xbf16>
    %222 = arith.truncf %219 : vector<32x8xf32> to vector<32x8xbf16>
    %cst_117 = arith.constant dense<0.000000e+00> : vector<32x8xf32>
    %223 = tpu.matmul %221, %222, %cst_117 {dimension_numbers = #tpu.dot_dimension_numbers<[1], [0], [0], [1], [0, 0, 1, 1], [], []>} : vector<32x32xbf16>, vector<32x8xbf16>, vector<32x8xf32> -> vector<32x8xf32>
    %cst_118 = arith.constant 0.000000e+00 : f32
    %224 = vector.broadcast %cst_118 : f32 to vector<32x8xf32>
    %225 = arith.maximumf %223, %224 : vector<32x8xf32>
    %226 = arith.truncf %215 : vector<8x8xf32> to vector<8x8xbf16>
    %c4 = arith.constant 4 : index
    %c0_119 = arith.constant 0 : index
    %c0_120 = arith.constant 0 : index
    %227 = vector.load %arg1[%c4, %c0_119, %c0_120] : memref<8x8x8xbf16, #tpu.memory_space<vmem>>, vector<1x8x8xbf16>
    %228 = vector.shape_cast %227 : vector<1x8x8xbf16> to vector<8x8xbf16>
    %cst_121 = arith.constant dense<0.000000e+00> : vector<8x8xf32>
    %229 = tpu.matmul %228, %5, %cst_121 {dimension_numbers = #tpu.dot_dimension_numbers<[1], [0], [0], [1], [0, 0, 1, 1], [], []>} : vector<8x8xbf16>, vector<8x8xbf16>, vector<8x8xf32> -> vector<8x8xf32>
    %cst_122 = arith.constant dense<0.000000e+00> : vector<8x8xf32>
    %230 = tpu.matmul %228, %7, %cst_122 {dimension_numbers = #tpu.dot_dimension_numbers<[1], [0], [0], [1], [0, 0, 1, 1], [], []>} : vector<8x8xbf16>, vector<8x8xbf16>, vector<8x8xf32> -> vector<8x8xf32>
    %cst_123 = arith.constant dense<0.000000e+00> : vector<8x8xf32>
    %231 = tpu.matmul %228, %9, %cst_123 {dimension_numbers = #tpu.dot_dimension_numbers<[1], [0], [0], [1], [0, 0, 1, 1], [], []>} : vector<8x8xbf16>, vector<8x8xbf16>, vector<8x8xf32> -> vector<8x8xf32>
    %cst_124 = arith.constant dense<0.000000e+00> : vector<8x8xf32>
    %232 = tpu.matmul %226, %11, %cst_124 {dimension_numbers = #tpu.dot_dimension_numbers<[1], [0], [0], [1], [0, 0, 1, 1], [], []>} : vector<8x8xbf16>, vector<8x8xbf16>, vector<8x8xf32> -> vector<8x8xf32>
    %cst_125 = arith.constant dense<0.000000e+00> : vector<8x8xf32>
    %233 = tpu.matmul %226, %13, %cst_125 {dimension_numbers = #tpu.dot_dimension_numbers<[1], [0], [0], [1], [0, 0, 1, 1], [], []>} : vector<8x8xbf16>, vector<8x8xbf16>, vector<8x8xf32> -> vector<8x8xf32>
    %cst_126 = arith.constant dense<0.000000e+00> : vector<8x8xf32>
    %234 = tpu.matmul %226, %15, %cst_126 {dimension_numbers = #tpu.dot_dimension_numbers<[1], [0], [0], [1], [0, 0, 1, 1], [], []>} : vector<8x8xbf16>, vector<8x8xbf16>, vector<8x8xf32> -> vector<8x8xf32>
    %235 = arith.addf %229, %232 : vector<8x8xf32>
    %236 = vector.broadcast %16 : vector<1x8xf32> to vector<8x8xf32>
    %237 = arith.addf %235, %236 : vector<8x8xf32>
    %238 = arith.negf %237 : vector<8x8xf32>
    %239 = math.exp %238 : vector<8x8xf32>
    %cst_127 = arith.constant 1.000000e+00 : f32
    %240 = vector.broadcast %cst_127 : f32 to vector<8x8xf32>
    %241 = arith.addf %240, %239 : vector<8x8xf32>
    %242 = arith.divf %240, %241 : vector<8x8xf32>
    %243 = arith.addf %230, %233 : vector<8x8xf32>
    %244 = vector.broadcast %17 : vector<1x8xf32> to vector<8x8xf32>
    %245 = arith.addf %243, %244 : vector<8x8xf32>
    %246 = arith.negf %245 : vector<8x8xf32>
    %247 = math.exp %246 : vector<8x8xf32>
    %cst_128 = arith.constant 1.000000e+00 : f32
    %248 = vector.broadcast %cst_128 : f32 to vector<8x8xf32>
    %249 = arith.addf %248, %247 : vector<8x8xf32>
    %250 = arith.divf %248, %249 : vector<8x8xf32>
    %251 = vector.broadcast %18 : vector<1x8xf32> to vector<8x8xf32>
    %252 = arith.addf %231, %251 : vector<8x8xf32>
    %253 = vector.broadcast %19 : vector<1x8xf32> to vector<8x8xf32>
    %254 = arith.addf %234, %253 : vector<8x8xf32>
    %255 = arith.mulf %242, %254 : vector<8x8xf32>
    %256 = arith.addf %252, %255 : vector<8x8xf32>
    %257 = math.tanh %256 : vector<8x8xf32>
    %cst_129 = arith.constant 1.000000e+00 : f32
    %258 = vector.broadcast %cst_129 : f32 to vector<8x8xf32>
    %259 = arith.subf %258, %250 : vector<8x8xf32>
    %260 = arith.mulf %259, %257 : vector<8x8xf32>
    %261 = arith.mulf %250, %215 : vector<8x8xf32>
    %262 = arith.addf %260, %261 : vector<8x8xf32>
    %c8_i32_130 = arith.constant 8 : i32
    %263 = arith.muli %arg0, %c8_i32_130 : i32
    %c4_i32 = arith.constant 4 : i32
    %264 = arith.addi %263, %c4_i32 : i32
    %c6_i32_131 = arith.constant 6 : i32
    %265 = arith.cmpi slt, %264, %c6_i32_131 : i32
    %266 = arith.select %265, %262, %215 : vector<8x8xf32>
    %267 = arith.truncf %266 : vector<8x8xf32> to vector<8x8xbf16>
    %c4_132 = arith.constant 4 : index
    %c0_133 = arith.constant 0 : index
    %c0_134 = arith.constant 0 : index
    %268 = vector.load %arg2[%c4_132, %c0_133, %c0_134] : memref<8x32x8xbf16, #tpu.memory_space<vmem>>, vector<1x32x8xbf16>
    %269 = vector.shape_cast %268 : vector<1x32x8xbf16> to vector<32x8xbf16>
    %cst_135 = arith.constant dense<0.000000e+00> : vector<32x8xf32>
    %270 = tpu.matmul %269, %267, %cst_135 {dimension_numbers = #tpu.dot_dimension_numbers<[1], [0], [0], [1], [0, 0, 1, 1], [], []>} : vector<32x8xbf16>, vector<8x8xbf16>, vector<32x8xf32> -> vector<32x8xf32>
    %c4_136 = arith.constant 4 : index
    %c0_137 = arith.constant 0 : index
    %c0_138 = arith.constant 0 : index
    %271 = vector.load %arg3[%c4_136, %c0_137, %c0_138] : memref<8x32x32xbf16, #tpu.memory_space<vmem>>, vector<1x32x32xbf16>
    %272 = vector.shape_cast %271 : vector<1x32x32xbf16> to vector<32x32xbf16>
    %273 = arith.truncf %270 : vector<32x8xf32> to vector<32x8xbf16>
    %cst_139 = arith.constant dense<0.000000e+00> : vector<32x8xf32>
    %274 = tpu.matmul %272, %273, %cst_139 {dimension_numbers = #tpu.dot_dimension_numbers<[1], [0], [0], [1], [0, 0, 1, 1], [], []>} : vector<32x32xbf16>, vector<32x8xbf16>, vector<32x8xf32> -> vector<32x8xf32>
    %cst_140 = arith.constant 0.000000e+00 : f32
    %275 = vector.broadcast %cst_140 : f32 to vector<32x8xf32>
    %276 = arith.maximumf %274, %275 : vector<32x8xf32>
    %277 = arith.truncf %266 : vector<8x8xf32> to vector<8x8xbf16>
    %c5 = arith.constant 5 : index
    %c0_141 = arith.constant 0 : index
    %c0_142 = arith.constant 0 : index
    %278 = vector.load %arg1[%c5, %c0_141, %c0_142] : memref<8x8x8xbf16, #tpu.memory_space<vmem>>, vector<1x8x8xbf16>
    %279 = vector.shape_cast %278 : vector<1x8x8xbf16> to vector<8x8xbf16>
    %cst_143 = arith.constant dense<0.000000e+00> : vector<8x8xf32>
    %280 = tpu.matmul %279, %5, %cst_143 {dimension_numbers = #tpu.dot_dimension_numbers<[1], [0], [0], [1], [0, 0, 1, 1], [], []>} : vector<8x8xbf16>, vector<8x8xbf16>, vector<8x8xf32> -> vector<8x8xf32>
    %cst_144 = arith.constant dense<0.000000e+00> : vector<8x8xf32>
    %281 = tpu.matmul %279, %7, %cst_144 {dimension_numbers = #tpu.dot_dimension_numbers<[1], [0], [0], [1], [0, 0, 1, 1], [], []>} : vector<8x8xbf16>, vector<8x8xbf16>, vector<8x8xf32> -> vector<8x8xf32>
    %cst_145 = arith.constant dense<0.000000e+00> : vector<8x8xf32>
    %282 = tpu.matmul %279, %9, %cst_145 {dimension_numbers = #tpu.dot_dimension_numbers<[1], [0], [0], [1], [0, 0, 1, 1], [], []>} : vector<8x8xbf16>, vector<8x8xbf16>, vector<8x8xf32> -> vector<8x8xf32>
    %cst_146 = arith.constant dense<0.000000e+00> : vector<8x8xf32>
    %283 = tpu.matmul %277, %11, %cst_146 {dimension_numbers = #tpu.dot_dimension_numbers<[1], [0], [0], [1], [0, 0, 1, 1], [], []>} : vector<8x8xbf16>, vector<8x8xbf16>, vector<8x8xf32> -> vector<8x8xf32>
    %cst_147 = arith.constant dense<0.000000e+00> : vector<8x8xf32>
    %284 = tpu.matmul %277, %13, %cst_147 {dimension_numbers = #tpu.dot_dimension_numbers<[1], [0], [0], [1], [0, 0, 1, 1], [], []>} : vector<8x8xbf16>, vector<8x8xbf16>, vector<8x8xf32> -> vector<8x8xf32>
    %cst_148 = arith.constant dense<0.000000e+00> : vector<8x8xf32>
    %285 = tpu.matmul %277, %15, %cst_148 {dimension_numbers = #tpu.dot_dimension_numbers<[1], [0], [0], [1], [0, 0, 1, 1], [], []>} : vector<8x8xbf16>, vector<8x8xbf16>, vector<8x8xf32> -> vector<8x8xf32>
    %286 = arith.addf %280, %283 : vector<8x8xf32>
    %287 = vector.broadcast %16 : vector<1x8xf32> to vector<8x8xf32>
    %288 = arith.addf %286, %287 : vector<8x8xf32>
    %289 = arith.negf %288 : vector<8x8xf32>
    %290 = math.exp %289 : vector<8x8xf32>
    %cst_149 = arith.constant 1.000000e+00 : f32
    %291 = vector.broadcast %cst_149 : f32 to vector<8x8xf32>
    %292 = arith.addf %291, %290 : vector<8x8xf32>
    %293 = arith.divf %291, %292 : vector<8x8xf32>
    %294 = arith.addf %281, %284 : vector<8x8xf32>
    %295 = vector.broadcast %17 : vector<1x8xf32> to vector<8x8xf32>
    %296 = arith.addf %294, %295 : vector<8x8xf32>
    %297 = arith.negf %296 : vector<8x8xf32>
    %298 = math.exp %297 : vector<8x8xf32>
    %cst_150 = arith.constant 1.000000e+00 : f32
    %299 = vector.broadcast %cst_150 : f32 to vector<8x8xf32>
    %300 = arith.addf %299, %298 : vector<8x8xf32>
    %301 = arith.divf %299, %300 : vector<8x8xf32>
    %302 = vector.broadcast %18 : vector<1x8xf32> to vector<8x8xf32>
    %303 = arith.addf %282, %302 : vector<8x8xf32>
    %304 = vector.broadcast %19 : vector<1x8xf32> to vector<8x8xf32>
    %305 = arith.addf %285, %304 : vector<8x8xf32>
    %306 = arith.mulf %293, %305 : vector<8x8xf32>
    %307 = arith.addf %303, %306 : vector<8x8xf32>
    %308 = math.tanh %307 : vector<8x8xf32>
    %cst_151 = arith.constant 1.000000e+00 : f32
    %309 = vector.broadcast %cst_151 : f32 to vector<8x8xf32>
    %310 = arith.subf %309, %301 : vector<8x8xf32>
    %311 = arith.mulf %310, %308 : vector<8x8xf32>
    %312 = arith.mulf %301, %266 : vector<8x8xf32>
    %313 = arith.addf %311, %312 : vector<8x8xf32>
    %c8_i32_152 = arith.constant 8 : i32
    %314 = arith.muli %arg0, %c8_i32_152 : i32
    %c5_i32 = arith.constant 5 : i32
    %315 = arith.addi %314, %c5_i32 : i32
    %c6_i32_153 = arith.constant 6 : i32
    %316 = arith.cmpi slt, %315, %c6_i32_153 : i32
    %317 = arith.select %316, %313, %266 : vector<8x8xf32>
    %318 = arith.truncf %317 : vector<8x8xf32> to vector<8x8xbf16>
    %c5_154 = arith.constant 5 : index
    %c0_155 = arith.constant 0 : index
    %c0_156 = arith.constant 0 : index
    %319 = vector.load %arg2[%c5_154, %c0_155, %c0_156] : memref<8x32x8xbf16, #tpu.memory_space<vmem>>, vector<1x32x8xbf16>
    %320 = vector.shape_cast %319 : vector<1x32x8xbf16> to vector<32x8xbf16>
    %cst_157 = arith.constant dense<0.000000e+00> : vector<32x8xf32>
    %321 = tpu.matmul %320, %318, %cst_157 {dimension_numbers = #tpu.dot_dimension_numbers<[1], [0], [0], [1], [0, 0, 1, 1], [], []>} : vector<32x8xbf16>, vector<8x8xbf16>, vector<32x8xf32> -> vector<32x8xf32>
    %c5_158 = arith.constant 5 : index
    %c0_159 = arith.constant 0 : index
    %c0_160 = arith.constant 0 : index
    %322 = vector.load %arg3[%c5_158, %c0_159, %c0_160] : memref<8x32x32xbf16, #tpu.memory_space<vmem>>, vector<1x32x32xbf16>
    %323 = vector.shape_cast %322 : vector<1x32x32xbf16> to vector<32x32xbf16>
    %324 = arith.truncf %321 : vector<32x8xf32> to vector<32x8xbf16>
    %cst_161 = arith.constant dense<0.000000e+00> : vector<32x8xf32>
    %325 = tpu.matmul %323, %324, %cst_161 {dimension_numbers = #tpu.dot_dimension_numbers<[1], [0], [0], [1], [0, 0, 1, 1], [], []>} : vector<32x32xbf16>, vector<32x8xbf16>, vector<32x8xf32> -> vector<32x8xf32>
    %cst_162 = arith.constant 0.000000e+00 : f32
    %326 = vector.broadcast %cst_162 : f32 to vector<32x8xf32>
    %327 = arith.maximumf %325, %326 : vector<32x8xf32>
    %328 = arith.truncf %317 : vector<8x8xf32> to vector<8x8xbf16>
    %c6 = arith.constant 6 : index
    %c0_163 = arith.constant 0 : index
    %c0_164 = arith.constant 0 : index
    %329 = vector.load %arg1[%c6, %c0_163, %c0_164] : memref<8x8x8xbf16, #tpu.memory_space<vmem>>, vector<1x8x8xbf16>
    %330 = vector.shape_cast %329 : vector<1x8x8xbf16> to vector<8x8xbf16>
    %cst_165 = arith.constant dense<0.000000e+00> : vector<8x8xf32>
    %331 = tpu.matmul %330, %5, %cst_165 {dimension_numbers = #tpu.dot_dimension_numbers<[1], [0], [0], [1], [0, 0, 1, 1], [], []>} : vector<8x8xbf16>, vector<8x8xbf16>, vector<8x8xf32> -> vector<8x8xf32>
    %cst_166 = arith.constant dense<0.000000e+00> : vector<8x8xf32>
    %332 = tpu.matmul %330, %7, %cst_166 {dimension_numbers = #tpu.dot_dimension_numbers<[1], [0], [0], [1], [0, 0, 1, 1], [], []>} : vector<8x8xbf16>, vector<8x8xbf16>, vector<8x8xf32> -> vector<8x8xf32>
    %cst_167 = arith.constant dense<0.000000e+00> : vector<8x8xf32>
    %333 = tpu.matmul %330, %9, %cst_167 {dimension_numbers = #tpu.dot_dimension_numbers<[1], [0], [0], [1], [0, 0, 1, 1], [], []>} : vector<8x8xbf16>, vector<8x8xbf16>, vector<8x8xf32> -> vector<8x8xf32>
    %cst_168 = arith.constant dense<0.000000e+00> : vector<8x8xf32>
    %334 = tpu.matmul %328, %11, %cst_168 {dimension_numbers = #tpu.dot_dimension_numbers<[1], [0], [0], [1], [0, 0, 1, 1], [], []>} : vector<8x8xbf16>, vector<8x8xbf16>, vector<8x8xf32> -> vector<8x8xf32>
    %cst_169 = arith.constant dense<0.000000e+00> : vector<8x8xf32>
    %335 = tpu.matmul %328, %13, %cst_169 {dimension_numbers = #tpu.dot_dimension_numbers<[1], [0], [0], [1], [0, 0, 1, 1], [], []>} : vector<8x8xbf16>, vector<8x8xbf16>, vector<8x8xf32> -> vector<8x8xf32>
    %cst_170 = arith.constant dense<0.000000e+00> : vector<8x8xf32>
    %336 = tpu.matmul %328, %15, %cst_170 {dimension_numbers = #tpu.dot_dimension_numbers<[1], [0], [0], [1], [0, 0, 1, 1], [], []>} : vector<8x8xbf16>, vector<8x8xbf16>, vector<8x8xf32> -> vector<8x8xf32>
    %337 = arith.addf %331, %334 : vector<8x8xf32>
    %338 = vector.broadcast %16 : vector<1x8xf32> to vector<8x8xf32>
    %339 = arith.addf %337, %338 : vector<8x8xf32>
    %340 = arith.negf %339 : vector<8x8xf32>
    %341 = math.exp %340 : vector<8x8xf32>
    %cst_171 = arith.constant 1.000000e+00 : f32
    %342 = vector.broadcast %cst_171 : f32 to vector<8x8xf32>
    %343 = arith.addf %342, %341 : vector<8x8xf32>
    %344 = arith.divf %342, %343 : vector<8x8xf32>
    %345 = arith.addf %332, %335 : vector<8x8xf32>
    %346 = vector.broadcast %17 : vector<1x8xf32> to vector<8x8xf32>
    %347 = arith.addf %345, %346 : vector<8x8xf32>
    %348 = arith.negf %347 : vector<8x8xf32>
    %349 = math.exp %348 : vector<8x8xf32>
    %cst_172 = arith.constant 1.000000e+00 : f32
    %350 = vector.broadcast %cst_172 : f32 to vector<8x8xf32>
    %351 = arith.addf %350, %349 : vector<8x8xf32>
    %352 = arith.divf %350, %351 : vector<8x8xf32>
    %353 = vector.broadcast %18 : vector<1x8xf32> to vector<8x8xf32>
    %354 = arith.addf %333, %353 : vector<8x8xf32>
    %355 = vector.broadcast %19 : vector<1x8xf32> to vector<8x8xf32>
    %356 = arith.addf %336, %355 : vector<8x8xf32>
    %357 = arith.mulf %344, %356 : vector<8x8xf32>
    %358 = arith.addf %354, %357 : vector<8x8xf32>
    %359 = math.tanh %358 : vector<8x8xf32>
    %cst_173 = arith.constant 1.000000e+00 : f32
    %360 = vector.broadcast %cst_173 : f32 to vector<8x8xf32>
    %361 = arith.subf %360, %352 : vector<8x8xf32>
    %362 = arith.mulf %361, %359 : vector<8x8xf32>
    %363 = arith.mulf %352, %317 : vector<8x8xf32>
    %364 = arith.addf %362, %363 : vector<8x8xf32>
    %c8_i32_174 = arith.constant 8 : i32
    %365 = arith.muli %arg0, %c8_i32_174 : i32
    %c6_i32_175 = arith.constant 6 : i32
    %366 = arith.addi %365, %c6_i32_175 : i32
    %c6_i32_176 = arith.constant 6 : i32
    %367 = arith.cmpi slt, %366, %c6_i32_176 : i32
    %368 = arith.select %367, %364, %317 : vector<8x8xf32>
    %369 = arith.truncf %368 : vector<8x8xf32> to vector<8x8xbf16>
    %c6_177 = arith.constant 6 : index
    %c0_178 = arith.constant 0 : index
    %c0_179 = arith.constant 0 : index
    %370 = vector.load %arg2[%c6_177, %c0_178, %c0_179] : memref<8x32x8xbf16, #tpu.memory_space<vmem>>, vector<1x32x8xbf16>
    %371 = vector.shape_cast %370 : vector<1x32x8xbf16> to vector<32x8xbf16>
    %cst_180 = arith.constant dense<0.000000e+00> : vector<32x8xf32>
    %372 = tpu.matmul %371, %369, %cst_180 {dimension_numbers = #tpu.dot_dimension_numbers<[1], [0], [0], [1], [0, 0, 1, 1], [], []>} : vector<32x8xbf16>, vector<8x8xbf16>, vector<32x8xf32> -> vector<32x8xf32>
    %c6_181 = arith.constant 6 : index
    %c0_182 = arith.constant 0 : index
    %c0_183 = arith.constant 0 : index
    %373 = vector.load %arg3[%c6_181, %c0_182, %c0_183] : memref<8x32x32xbf16, #tpu.memory_space<vmem>>, vector<1x32x32xbf16>
    %374 = vector.shape_cast %373 : vector<1x32x32xbf16> to vector<32x32xbf16>
    %375 = arith.truncf %372 : vector<32x8xf32> to vector<32x8xbf16>
    %cst_184 = arith.constant dense<0.000000e+00> : vector<32x8xf32>
    %376 = tpu.matmul %374, %375, %cst_184 {dimension_numbers = #tpu.dot_dimension_numbers<[1], [0], [0], [1], [0, 0, 1, 1], [], []>} : vector<32x32xbf16>, vector<32x8xbf16>, vector<32x8xf32> -> vector<32x8xf32>
    %cst_185 = arith.constant 0.000000e+00 : f32
    %377 = vector.broadcast %cst_185 : f32 to vector<32x8xf32>
    %378 = arith.maximumf %376, %377 : vector<32x8xf32>
    %379 = arith.truncf %368 : vector<8x8xf32> to vector<8x8xbf16>
    %c7 = arith.constant 7 : index
    %c0_186 = arith.constant 0 : index
    %c0_187 = arith.constant 0 : index
    %380 = vector.load %arg1[%c7, %c0_186, %c0_187] : memref<8x8x8xbf16, #tpu.memory_space<vmem>>, vector<1x8x8xbf16>
    %381 = vector.shape_cast %380 : vector<1x8x8xbf16> to vector<8x8xbf16>
    %cst_188 = arith.constant dense<0.000000e+00> : vector<8x8xf32>
    %382 = tpu.matmul %381, %5, %cst_188 {dimension_numbers = #tpu.dot_dimension_numbers<[1], [0], [0], [1], [0, 0, 1, 1], [], []>} : vector<8x8xbf16>, vector<8x8xbf16>, vector<8x8xf32> -> vector<8x8xf32>
    %cst_189 = arith.constant dense<0.000000e+00> : vector<8x8xf32>
    %383 = tpu.matmul %381, %7, %cst_189 {dimension_numbers = #tpu.dot_dimension_numbers<[1], [0], [0], [1], [0, 0, 1, 1], [], []>} : vector<8x8xbf16>, vector<8x8xbf16>, vector<8x8xf32> -> vector<8x8xf32>
    %cst_190 = arith.constant dense<0.000000e+00> : vector<8x8xf32>
    %384 = tpu.matmul %381, %9, %cst_190 {dimension_numbers = #tpu.dot_dimension_numbers<[1], [0], [0], [1], [0, 0, 1, 1], [], []>} : vector<8x8xbf16>, vector<8x8xbf16>, vector<8x8xf32> -> vector<8x8xf32>
    %cst_191 = arith.constant dense<0.000000e+00> : vector<8x8xf32>
    %385 = tpu.matmul %379, %11, %cst_191 {dimension_numbers = #tpu.dot_dimension_numbers<[1], [0], [0], [1], [0, 0, 1, 1], [], []>} : vector<8x8xbf16>, vector<8x8xbf16>, vector<8x8xf32> -> vector<8x8xf32>
    %cst_192 = arith.constant dense<0.000000e+00> : vector<8x8xf32>
    %386 = tpu.matmul %379, %13, %cst_192 {dimension_numbers = #tpu.dot_dimension_numbers<[1], [0], [0], [1], [0, 0, 1, 1], [], []>} : vector<8x8xbf16>, vector<8x8xbf16>, vector<8x8xf32> -> vector<8x8xf32>
    %cst_193 = arith.constant dense<0.000000e+00> : vector<8x8xf32>
    %387 = tpu.matmul %379, %15, %cst_193 {dimension_numbers = #tpu.dot_dimension_numbers<[1], [0], [0], [1], [0, 0, 1, 1], [], []>} : vector<8x8xbf16>, vector<8x8xbf16>, vector<8x8xf32> -> vector<8x8xf32>
    %388 = arith.addf %382, %385 : vector<8x8xf32>
    %389 = vector.broadcast %16 : vector<1x8xf32> to vector<8x8xf32>
    %390 = arith.addf %388, %389 : vector<8x8xf32>
    %391 = arith.negf %390 : vector<8x8xf32>
    %392 = math.exp %391 : vector<8x8xf32>
    %cst_194 = arith.constant 1.000000e+00 : f32
    %393 = vector.broadcast %cst_194 : f32 to vector<8x8xf32>
    %394 = arith.addf %393, %392 : vector<8x8xf32>
    %395 = arith.divf %393, %394 : vector<8x8xf32>
    %396 = arith.addf %383, %386 : vector<8x8xf32>
    %397 = vector.broadcast %17 : vector<1x8xf32> to vector<8x8xf32>
    %398 = arith.addf %396, %397 : vector<8x8xf32>
    %399 = arith.negf %398 : vector<8x8xf32>
    %400 = math.exp %399 : vector<8x8xf32>
    %cst_195 = arith.constant 1.000000e+00 : f32
    %401 = vector.broadcast %cst_195 : f32 to vector<8x8xf32>
    %402 = arith.addf %401, %400 : vector<8x8xf32>
    %403 = arith.divf %401, %402 : vector<8x8xf32>
    %404 = vector.broadcast %18 : vector<1x8xf32> to vector<8x8xf32>
    %405 = arith.addf %384, %404 : vector<8x8xf32>
    %406 = vector.broadcast %19 : vector<1x8xf32> to vector<8x8xf32>
    %407 = arith.addf %387, %406 : vector<8x8xf32>
    %408 = arith.mulf %395, %407 : vector<8x8xf32>
    %409 = arith.addf %405, %408 : vector<8x8xf32>
    %410 = math.tanh %409 : vector<8x8xf32>
    %cst_196 = arith.constant 1.000000e+00 : f32
    %411 = vector.broadcast %cst_196 : f32 to vector<8x8xf32>
    %412 = arith.subf %411, %403 : vector<8x8xf32>
    %413 = arith.mulf %412, %410 : vector<8x8xf32>
    %414 = arith.mulf %403, %368 : vector<8x8xf32>
    %415 = arith.addf %413, %414 : vector<8x8xf32>
    %c8_i32_197 = arith.constant 8 : i32
    %416 = arith.muli %arg0, %c8_i32_197 : i32
    %c7_i32 = arith.constant 7 : i32
    %417 = arith.addi %416, %c7_i32 : i32
    %c6_i32_198 = arith.constant 6 : i32
    %418 = arith.cmpi slt, %417, %c6_i32_198 : i32
    %419 = arith.select %418, %415, %368 : vector<8x8xf32>
    %420 = arith.truncf %419 : vector<8x8xf32> to vector<8x8xbf16>
    %c7_199 = arith.constant 7 : index
    %c0_200 = arith.constant 0 : index
    %c0_201 = arith.constant 0 : index
    %421 = vector.load %arg2[%c7_199, %c0_200, %c0_201] : memref<8x32x8xbf16, #tpu.memory_space<vmem>>, vector<1x32x8xbf16>
    %422 = vector.shape_cast %421 : vector<1x32x8xbf16> to vector<32x8xbf16>
    %cst_202 = arith.constant dense<0.000000e+00> : vector<32x8xf32>
    %423 = tpu.matmul %422, %420, %cst_202 {dimension_numbers = #tpu.dot_dimension_numbers<[1], [0], [0], [1], [0, 0, 1, 1], [], []>} : vector<32x8xbf16>, vector<8x8xbf16>, vector<32x8xf32> -> vector<32x8xf32>
    %c7_203 = arith.constant 7 : index
    %c0_204 = arith.constant 0 : index
    %c0_205 = arith.constant 0 : index
    %424 = vector.load %arg3[%c7_203, %c0_204, %c0_205] : memref<8x32x32xbf16, #tpu.memory_space<vmem>>, vector<1x32x32xbf16>
    %425 = vector.shape_cast %424 : vector<1x32x32xbf16> to vector<32x32xbf16>
    %426 = arith.truncf %423 : vector<32x8xf32> to vector<32x8xbf16>
    %cst_206 = arith.constant dense<0.000000e+00> : vector<32x8xf32>
    %427 = tpu.matmul %425, %426, %cst_206 {dimension_numbers = #tpu.dot_dimension_numbers<[1], [0], [0], [1], [0, 0, 1, 1], [], []>} : vector<32x32xbf16>, vector<32x8xbf16>, vector<32x8xf32> -> vector<32x8xf32>
    %cst_207 = arith.constant 0.000000e+00 : f32
    %428 = vector.broadcast %cst_207 : f32 to vector<32x8xf32>
    %429 = arith.maximumf %427, %428 : vector<32x8xf32>
    %c0_208 = arith.constant 0 : index
    %c0_209 = arith.constant 0 : index
    %430 = vector.load %arg11[%c0_208, %c0_209] : memref<8x8xf32, #tpu.memory_space<vmem>>, vector<8x8xf32>
    tpu.vector_store %arg11[%c0_208, %c0_209], %419 {strides = array<i32>} : memref<8x8xf32, #tpu.memory_space<vmem>>, vector<8x8xf32>,
    %431 = vector.shape_cast %72 : vector<32x8xf32> to vector<1x32x8xf32>
    %432 = vector.shape_cast %123 : vector<32x8xf32> to vector<1x32x8xf32>
    %433 = vector.shape_cast %174 : vector<32x8xf32> to vector<1x32x8xf32>
    %434 = vector.shape_cast %225 : vector<32x8xf32> to vector<1x32x8xf32>
    %435 = vector.shape_cast %276 : vector<32x8xf32> to vector<1x32x8xf32>
    %436 = vector.shape_cast %327 : vector<32x8xf32> to vector<1x32x8xf32>
    %437 = vector.shape_cast %378 : vector<32x8xf32> to vector<1x32x8xf32>
    %438 = vector.shape_cast %429 : vector<32x8xf32> to vector<1x32x8xf32>
    %439 = tpu.concatenate %431, %432, %433, %434, %435, %436, %437, %438 in 0 : vector<1x32x8xf32>, vector<1x32x8xf32>, vector<1x32x8xf32>, vector<1x32x8xf32>, vector<1x32x8xf32>, vector<1x32x8xf32>, vector<1x32x8xf32>, vector<1x32x8xf32> -> vector<8x32x8xf32>
    %440 = vector.shape_cast %20 : vector<1x8xf32> to vector<1x1x8xf32>
    %441 = vector.broadcast %440 : vector<1x1x8xf32> to vector<8x32x8xf32>
    %442 = arith.mulf %439, %441 : vector<8x32x8xf32>
    %cst_210 = arith.constant dense<0.000000e+00> : vector<8x32xf32>
    %443 = vector.multi_reduction <add>, %442, %cst_210 [2] : vector<8x32x8xf32> to vector<8x32xf32>
    %444 = vector.broadcast %21 : f32 to vector<8x32xf32>
    %445 = arith.addf %443, %444 : vector<8x32xf32>
    %cst_211 = arith.constant 0.000000e+00 : f32
    %446 = vector.broadcast %cst_211 : f32 to vector<8x96xf32>
    %447 = tpu.concatenate %445, %446 in 1 : vector<8x32xf32>, vector<8x96xf32> -> vector<8x128xf32>
    %c0_212 = arith.constant 0 : index
    %c0_213 = arith.constant 0 : index
    %448 = vector.load %arg10[%c0_212, %c0_213] : memref<8x128xf32, #tpu.memory_space<vmem>>, vector<8x128xf32>
    tpu.vector_store %arg10[%c0_212, %c0_213], %447 {strides = array<i32>} : memref<8x128xf32, #tpu.memory_space<vmem>>, vector<8x128xf32>,
    return
  }
  func.func @transform_0(%arg0: i32) -> (i32, i32, i32) {
    %c0_i32 = arith.constant 0 : i32
    %c0_i32_0 = arith.constant 0 : i32
    %c0_i32_1 = arith.constant 0 : i32
    return %arg0, %c0_i32, %c0_i32_0 : i32, i32, i32
  }
  func.func @transform_1(%arg0: i32) -> (i32, i32, i32) {
    %c0_i32 = arith.constant 0 : i32
    %c0_i32_0 = arith.constant 0 : i32
    %c0_i32_1 = arith.constant 0 : i32
    return %arg0, %c0_i32, %c0_i32_0 : i32, i32, i32
  }
  func.func @transform_2(%arg0: i32) -> (i32, i32, i32) {
    %c0_i32 = arith.constant 0 : i32
    %c0_i32_0 = arith.constant 0 : i32
    %c0_i32_1 = arith.constant 0 : i32
    return %arg0, %c0_i32, %c0_i32_0 : i32, i32, i32
  }
  func.func @transform_3(%arg0: i32) -> (i32, i32) {
    %c0_i32 = arith.constant 0 : i32
    %c0_i32_0 = arith.constant 0 : i32
    %c0_i32_1 = arith.constant 0 : i32
    return %c0_i32, %c0_i32_0 : i32, i32
  }
  func.func @transform_4(%arg0: i32) -> (i32, i32, i32) {
    %c0_i32 = arith.constant 0 : i32
    %c0_i32_0 = arith.constant 0 : i32
    %c0_i32_1 = arith.constant 0 : i32
    %c0_i32_2 = arith.constant 0 : i32
    return %c0_i32, %c0_i32_0, %c0_i32_1 : i32, i32, i32
  }
  func.func @transform_5(%arg0: i32) -> (i32, i32, i32) {
    %c0_i32 = arith.constant 0 : i32
    %c0_i32_0 = arith.constant 0 : i32
    %c0_i32_1 = arith.constant 0 : i32
    %c0_i32_2 = arith.constant 0 : i32
    return %c0_i32, %c0_i32_0, %c0_i32_1 : i32, i32, i32
  }
  func.func @transform_6(%arg0: i32) -> (i32, i32) {
    %c0_i32 = arith.constant 0 : i32
    %c0_i32_0 = arith.constant 0 : i32
    %c0_i32_1 = arith.constant 0 : i32
    return %c0_i32, %c0_i32_0 : i32, i32
  }
  func.func @transform_7(%arg0: i32) -> (i32, i32) {
    %c0_i32 = arith.constant 0 : i32
    %c0_i32_0 = arith.constant 0 : i32
    %c0_i32_1 = arith.constant 0 : i32
    return %c0_i32, %c0_i32_0 : i32, i32
  }
  func.func @transform_8(%arg0: i32) -> (i32, i32) {
    %c0_i32 = arith.constant 0 : i32
    %c0_i32_0 = arith.constant 0 : i32
    %c0_i32_1 = arith.constant 0 : i32
    return %c0_i32, %c0_i32_0 : i32, i32
  }
  func.func @transform_9(%arg0: i32) -> (i32, i32) {
    %c0_i32 = arith.constant 0 : i32
    %c0_i32_0 = arith.constant 0 : i32
    return %arg0, %c0_i32 : i32, i32
  }
  func.func @transform_10(%arg0: i32) -> (i32, i32) {
    %c0_i32 = arith.constant 0 : i32
    %c0_i32_0 = arith.constant 0 : i32
    %c0_i32_1 = arith.constant 0 : i32
    return %c0_i32, %c0_i32_0 : i32, i32
  }
}

</mosaic_0001>

<bundles_post_ra>
// kernel: recurrent_gcn_forward.1
= control target key start
LH: loop header
LB: loop body
LE: loop exit
PB: predicated region body
PF: predicated region fallthrough
CT: control target
= control target key end

     0   :  { %vm67_vm0 = vcmask 1043456   ;;  %v4768_v2 = vmov 0.0   ;;  %vm4769_vm1 = vmmov 0   ;;  %vm42_vm2 = vcmask 64512   ;;  %s5586_s0 = inlined_call_operand.vmem [shape: bf16[8,8,8], index: 0, kind: input, shape index: {}]   ;;  %s5587_s1 = inlined_call_operand.vmem [shape: bf16[8,32,8], index: 1, kind: input, shape index: {}]   ;;  %s5588_s2 = inlined_call_operand.vmem [shape: bf16[8,32,32], index: 2, kind: input, shape index: {}]   ;;  %s5589_s3 = inlined_call_operand.vmem [shape: f32[8,8], index: 3, kind: input, shape index: {}]   ;;  %s5590_s4 = inlined_call_operand.vmem [shape: bf16[3,8,8], index: 4, kind: input, shape index: {}]   ;;  %s5591_s5 = inlined_call_operand.vmem [shape: bf16[3,8,8], index: 5, kind: input, shape index: {}]   ;;  %s5592_s6 = inlined_call_operand.vmem [shape: f32[4,8], index: 6, kind: input, shape index: {}]   ;;  %s5593_s7 = inlined_call_operand.vmem [shape: f32[1,8], index: 7, kind: input, shape index: {}]   ;;  %s5594_s8 = inlined_call_operand.<no memory space> [shape: f32[1,1], index: 8, kind: input, shape index: {}]   ;;  %s5595_s9 = inlined_call_operand.vmem [shape: f32[8,128], index: 9, kind: output, shape index: {0}]   ;;  %s5596_s10 = inlined_call_operand.hbm [shape: f32[8,8], index: 10, kind: output, shape index: {1}]  }
   0x1   :  { %v50_v0 = vld [vmem:[%s5591_s5] sm:$0xf]  ;;  %4236 = vmatprep.subr.bf16.mxu0 %v4768_v2  ;;  %4238 = vmatprep.mubr.msk.bf16.mxu0 %vm4769_vm1, %v4768_v2  ;;  %v3886_v4 = vld [vmem:[%s5591_s5 + $0x4] sm:$0xf]  ;;  %v3887_v9 = vld [vmem:[%s5591_s5 + $0x8] sm:$0xf] }
   0x2   :  { %v41_v1 = vld [vmem:[%s5589_s3] sm:$0xff]  ;;  %v4834_v3 = vsel %vm67_vm0, %v50_v0, 0  ;;  %4242 = vmatprep.subr.bf16.mxu1 %v4768_v2  ;;  %v4848_v6 = vsel %vm67_vm0, %v3886_v4, 0  ;;  %4244 = vmatprep.mubr.msk.bf16.mxu1 %vm4769_vm1, %v4768_v2  ;;  %v4868_v11 = vsel %vm67_vm0, %v3887_v9, 0  ;;  %v3885_v12 = vld [vmem:[%s5590_s4 + $0x8] sm:$0xf] }
   0x3   :  { %v45_v5 = vld [vmem:[%s5590_s4] sm:$0xf]  ;;  %4237 = vmatpush3.bf16.msra.mxu0 %v4834_v3  ;;  %43 = vst.msk [vmem:[#allocation3] sm:$0xff] %vm42_vm2, %v41_v1  ;;  %v3884_v7 = vld [vmem:[%s5590_s4 + $0x4] sm:$0xf]  ;;  %4243 = vmatpush3.bf16.msra.mxu1 %v4848_v6  ;;  %v4876_v14 = vsel %vm67_vm0, %v3885_v12, 0 }
   0x4   :  { %v4857_v8 = vsel %vm67_vm0, %v45_v5, 0  ;;  %4248 = vmatprep.subr.bf16.mxu0 %v4768_v2  ;;  %4254 = vmatprep.subr.bf16.mxu1 %v4768_v2  ;;  %v4865_v10 = vsel %vm67_vm0, %v3884_v7, 0  ;;  %v62_v16 = vld [vmem:[%s5586_s0] sm:$0xf] }
   0xa   :  { %v4873_v13 = vld [vmem:[#allocation3] sm:$0xff] }
   0xb   :  { %v61_v15 = vpack.c.bf16 %v4873_v13, %v4873_v13 }
   0xd   :  { %4239 = vmatmul.mubr.msk.bf16.vlgmr.msra.gmra.mrb[0].mxu0 %vm42_vm2, %v61_v15  ;;  %4245 = vmatmul.mubr.msk.bf16.vlgmr.msra.gmra.mrb[0].mxu1 %vm42_vm2, %v61_v15 }
   0xe   :  { %4249 = vmatpush3.bf16.msra.mxu0 %v4857_v8  ;;  %4250 = vmatprep.mubr.msk.bf16.mxu0 %vm4769_vm1, %v4768_v2 }
   0xf   :  { %4255 = vmatpush3.bf16.msra.mxu1 %v4865_v10  ;;  %4256 = vmatprep.mubr.msk.bf16.mxu1 %vm4769_vm1, %v4768_v2 }
  0x10   :  { %4266 = vmatprep.subr.bf16.mxu1 %v4768_v2  ;;  %4260 = vmatprep.subr.bf16.mxu0 %v4768_v2 }
  0x15   :  { %4251 = vmatmul.mubr.msk.bf16.vlgmr.msra.gmra.mrb[4].mxu0 %vm42_vm2, %v62_v16  ;;  %4257 = vmatmul.mubr.msk.bf16.vlgmr.msra.gmra.mrb[4].mxu1 %vm42_vm2, %v62_v16 }
  0x16   :  { %4267 = vmatpush3.bf16.msra.mxu1 %v4868_v11  ;;  %4261 = vmatpush3.bf16.msra.mxu0 %v4876_v14 }
  0x17   :  { %4268 = vmatprep.mubr.msk.bf16.mxu1 %vm4769_vm1, %v4768_v2  ;;  %4262 = vmatprep.mubr.msk.bf16.mxu0 %vm4769_vm1, %v4768_v2 }
  0x18   :  { %17 = vsyncpa [#allocation4], 0  ;;  %v4647_v17 = vld [vmem:[%s5587_s1] sm:$0xff]   ;;  %v4648_v9 = vld [vmem:[%s5587_s1 + $0x8] sm:$0xff]   ;;  %vm461_vm3 = vcmask 261120  }
  0x19   :  { %v4910_v26 = vld [vmem:[%s5592_s6] ss:$0 sm:$0xff]  ;;  %v4916_v37 = vld [vmem:[%s5592_s6 + $0x1] ss:$0 sm:$0xff]  ;;  %v4922_v53 = vld [vmem:[%s5592_s6 + $0x3] ss:$0 sm:$0xff] }
  0x1a   :  { %v4927_v54 = vld [vmem:[%s5592_s6 + $0x2] ss:$0 sm:$0xff]  ;;  %v3908_v12 = vld [vmem:[%s5586_s0 + $0x4] sm:$0xf] }
  0x1d   :  { %4269 = vmatmul.mubr.msk.bf16.vlgmr.msra.gmra.mrb[8].mxu1 %vm42_vm2, %v61_v15  ;;  %4263 = vmatmul.mubr.msk.bf16.vlgmr.msra.gmra.mrb[8].mxu0 %vm42_vm2, %v62_v16 }
  0x1e   :  { %4274 = vmatprep.mubr.msk.bf16.mxu0 %vm42_vm2, %v4647_v17 }
  0xe0   :  { %v105_v18 = vpop.f32.mrb[0].mxu0  ;;  %v148_v19 = vpop.f32.mrb[0].mxu1 }
  0xe1   :  { %v4240_v20 = vpop.f32.mrb[1].mxu0  ;;  %v4246_v21 = vpop.f32.mrb[1].mxu1 }
  0xe2   :  { %v108_v22 = vpop.f32.mrb[2].mxu0  ;;  %v151_v23 = vpop.f32.mrb[2].mxu1 }
  0xe3   :  { %v4241_v24 = vpop.f32.mrb[3].mxu0  ;;  %v4247_v25 = vpop.f32.mrb[3].mxu1 }
  0xe4   :  { %v4650_v24 = vld [vmem:[%s5588_s2 + $0x8] sm:$0xff]  }
  0xe8   :  { %v194_v27 = vpop.f32.mrb[4].mxu0  ;;  %v248_v28 = vpop.f32.mrb[4].mxu1 }
  0xe9   :  { %v195_v29 = vadd.f32 %v194_v27, %v105_v18  ;;  %v4252_v30 = vpop.f32.mrb[5].mxu0  ;;  %v249_v31 = vadd.f32 %v248_v28, %v148_v19  ;;  %v4258_v32 = vpop.f32.mrb[5].mxu1 }
  0xea   :  { %v197_v33 = vpop.f32.mrb[6].mxu0  ;;  %v251_v34 = vpop.f32.mrb[6].mxu1 }
  0xeb   :  { %v204_v35 = vadd.f32 %v4910_v26, %v195_v29  ;;  %v4253_v36 = vpop.f32.mrb[7].mxu0  ;;  %v4259_v38 = vpop.f32.mrb[7].mxu1  ;;  %v258_v40 = vadd.f32 %v4916_v37, %v249_v31 }
  0xec   :  { %v4651_v36 = vld [vmem:[%s5587_s1 + $0x10] sm:$0xff]  }
  0xed   :  { %v3892_v39 = vmul.f32 -1.442695, %v204_v35  ;;  %v3895_v45 = vmul.f32 -1.442695, %v258_v40 }
  0xef   :  { %4679 = vpow2.f32 %v3892_v39 }
  0xf0   :  { %v353_v41 = vpop.f32.mrb[8].mxu1  ;;  %v306_v42 = vpop.f32.mrb[8].mxu0  ;;  %4681 = vpow2.f32 %v3895_v45 }
  0xf1   :  { %v4270_v43 = vpop.f32.mrb[9].mxu1  ;;  %v4264_v44 = vpop.f32.mrb[9].mxu0  ;;  %v354_v56 = vadd.f32 %v4922_v53, %v353_v41  ;;  %v307_v57 = vadd.f32 %v4927_v54, %v306_v42  ;;  %v4991_v41 = vld [vmem:[%s5593_s7] ss:$0 sm:$0xff] }
  0xf2   :  { %v356_v46 = vpop.f32.mrb[10].mxu1  ;;  %v309_v47 = vpop.f32.mrb[10].mxu0 }
  0xf3   :  { %v4271_v48 = vpop.f32.mrb[11].mxu1  ;;  %v4265_v49 = vpop.f32.mrb[11].mxu0 }
  0xf9   :  { %v4680_v50 = vpop.eup %4679 }
  0xfa   :  { %v208_v51 = vadd.f32 1.0, %v4680_v50  ;;  %v4682_v52 = vpop.eup %4681 }
  0xfb   :  { %v262_v55 = vadd.f32 1.0, %v4682_v52 }
  0xfc   :  { %4683 = vrcp.f32 %v208_v51 }
  0xfd   :  { %4685 = vrcp.f32 %v262_v55 }
 0x106   :  { %v4684_v58 = vpop.eup %4683 }
 0x107   :  { %v359_v59 = vmul.f32 %v4684_v58, %v354_v56  ;;  %v4686_v61 = vpop.eup %4685 }
 0x108   :  { %v362_v62 = vsub.f32 1.0, %v4686_v61  ;;  %v364_v1 = vmul.f32 %v4686_v61, %v4873_v13  ;;  %v4649_v13 = vld [vmem:[%s5588_s2] sm:$0xff]  }
 0x109   :  { %v360_v60 = vadd.f32 %v359_v59, %v307_v57  ;;  %4282 = vmatprep.mubr.msk.bf16.mxu1 %vm461_vm3, %v4649_v13 }
 0x10b   :  { %4687 = vtanh.f32 %v360_v60 }
 0x115   :  { %v4688_v63 = vpop.eup %4687 }
 0x116   :  { %v363_v0 = vmul.f32 %v4688_v63, %v362_v62 }
 0x118   :  { %v4932_v4 = vadd.f32 %v364_v1, %v363_v0 }
 0x11a   :  { %v372_v5 = vpack.c.bf16 %v4932_v4, %v4932_v4 }
 0x11c   :  { %4636 = vmatprep.subr.msk.bf16.mxu0 %vm67_vm0, %v372_v5  ;;  %v394_v7 = vsel %vm67_vm0, %v372_v5, 0 }
 0x11d   :  { %4273 = vmatpush3.bf16.msra.mxu0 %v394_v7 }
 0x11e   :  { %4286 = vmatprep.subr.bf16.mxu0 %v4768_v2 }
 0x120   :  { %4275 = vmatmul.mubr.msk.bf16.vlgmr.msra.gmra.mrb[12].mxu0 %vm42_vm2, %v4648_v9 }
 0x121   :  { %4287 = vmatpush3.bf16.msra.mxu0 %v4834_v3  ;;  %4288 = vmatprep.mubr.msk.bf16.mxu0 %vm4769_vm1, %v4768_v2 }
 0x122   :  { %4298 = vmatprep.subr.bf16.mxu0 %v4768_v2 }
 0x128   :  { %4289 = vmatmul.mubr.msk.bf16.vlgmr.msra.gmra.mrb[16].mxu0 %vm42_vm2, %v372_v5 }
 0x129   :  { %4299 = vmatpush3.bf16.msra.mxu0 %v4857_v8  ;;  %4300 = vmatprep.mubr.msk.bf16.mxu0 %vm4769_vm1, %v4768_v2 }
 0x12a   :  { %4310 = vmatprep.subr.bf16.mxu0 %v4768_v2 }
 0x130   :  { %4301 = vmatmul.mubr.msk.bf16.vlgmr.msra.gmra.mrb[20].mxu0 %vm42_vm2, %v3908_v12 }
 0x131   :  { %4311 = vmatpush3.bf16.msra.mxu0 %v4876_v14  ;;  %4312 = vmatprep.mubr.msk.bf16.mxu0 %vm4769_vm1, %v4768_v2 }
 0x138   :  { %4313 = vmatmul.mubr.msk.bf16.vlgmr.msra.gmra.mrb[24].mxu0 %vm42_vm2, %v3908_v12 }
 0x139   :  { %4324 = vmatprep.mubr.msk.bf16.mxu0 %vm42_vm2, %v4651_v36  ;;  %v4652_v36 = vld [vmem:[%s5587_s1 + $0x18] sm:$0xff]  }
 0x1f3   :  { %v4276_v15 = vpop.f32.mrb[12].mxu0 }
 0x1f4   :  { %v430_v16 = vpop.f32.mrb[13].mxu0 }
 0x1f5   :  { %v4277_v17 = vpop.f32.mrb[14].mxu0 }
 0x1f6   :  { %v450_v18 = vpack.c.bf16 %v4277_v17, %v4276_v15  ;;  %v433_v19 = vpop.f32.mrb[15].mxu0 }
 0x1f7   :  { %v449_v20 = vpack.c.bf16 %v433_v19, %v430_v16 }
 0x1f9   :  { %4278 = vmatprep.subr.bf16.mxu1 %v449_v20 }
 0x1fa   :  { %4279 = vmatpush3.bf16.msra.mxu1 %v449_v20 }
 0x1fb   :  { %4280 = vmatprep.subr.bf16.mxu1 %v450_v18  ;;  %v559_v21 = vpop.f32.mrb[16].mxu0 }
 0x1fc   :  { %v4290_v22 = vpop.f32.mrb[17].mxu0 }
 0x1fd   :  { %v562_v23 = vpop.f32.mrb[18].mxu0 }
 0x1fe   :  { %4281 = vmatpush3.bf16.msra.mxu1 %v450_v18  ;;  %v4291_v25 = vpop.f32.mrb[19].mxu0 }
 0x1ff   :  { %4292 = vmatprep.subr.bf16.mxu1 %v4768_v2 }
 0x201   :  { %4283 = vmatmul.mubr.msk.bf16.vlgmr.msra.gmra.mrb[12].mxu1 %vm461_vm3, %v4650_v24 }
 0x202   :  { %4293 = vmatpush3.bf16.msra.mxu1 %v4848_v6  ;;  %4294 = vmatprep.mubr.msk.bf16.mxu1 %vm4769_vm1, %v4768_v2 }
 0x203   :  { %v642_v27 = vpop.f32.mrb[20].mxu0  ;;  %4304 = vmatprep.subr.bf16.mxu1 %v4768_v2 }
 0x204   :  { %v643_v28 = vadd.f32 %v642_v27, %v559_v21  ;;  %v4302_v29 = vpop.f32.mrb[21].mxu0 }
 0x205   :  { %v645_v30 = vpop.f32.mrb[22].mxu0 }
 0x206   :  { %v4303_v31 = vpop.f32.mrb[23].mxu0  ;;  %v648_v38 = vadd.f32 %v4910_v26, %v643_v28 }
 0x208   :  { %v3912_v39 = vmul.f32 -1.442695, %v648_v38  ;;  %v4653_v38 = vld [vmem:[%s5588_s2 + $0x10] sm:$0xff]  }
 0x209   :  { %4295 = vmatmul.mubr.msk.bf16.vlgmr.msra.gmra.mrb[16].mxu1 %vm42_vm2, %v372_v5 }
 0x20a   :  { %4305 = vmatpush3.bf16.msra.mxu1 %v4865_v10  ;;  %4306 = vmatprep.mubr.msk.bf16.mxu1 %vm4769_vm1, %v4768_v2  ;;  %4689 = vpow2.f32 %v3912_v39 }
 0x20b   :  { %4316 = vmatprep.subr.bf16.mxu1 %v4768_v2  ;;  %v736_v32 = vpop.f32.mrb[24].mxu0 }
 0x20c   :  { %v4314_v33 = vpop.f32.mrb[25].mxu0  ;;  %v737_v19 = vadd.f32 %v4927_v54, %v736_v32 }
 0x20d   :  { %v739_v34 = vpop.f32.mrb[26].mxu0 }
 0x20e   :  { %v4315_v35 = vpop.f32.mrb[27].mxu0 }
 0x211   :  { %4307 = vmatmul.mubr.msk.bf16.vlgmr.msra.gmra.mrb[20].mxu1 %vm42_vm2, %v3908_v12 }
 0x212   :  { %4317 = vmatpush3.bf16.msra.mxu1 %v4868_v11  ;;  %4318 = vmatprep.mubr.msk.bf16.mxu1 %vm4769_vm1, %v4768_v2 }
 0x214   :  { %v4690_v52 = vpop.eup %4689 }
 0x215   :  { %v652_v61 = vadd.f32 1.0, %v4690_v52 }
 0x217   :  { %4691 = vrcp.f32 %v652_v61 }
 0x219   :  { %4319 = vmatmul.mubr.msk.bf16.vlgmr.msra.gmra.mrb[24].mxu1 %vm42_vm2, %v372_v5 }
 0x21a   :  { %4332 = vmatprep.mubr.msk.bf16.mxu1 %vm461_vm3, %v4653_v38 }
 0x221   :  { %v4692_v20 = vpop.eup %4691 }
 0x2d4   :  { %v4284_v40 = vpop.f32.mrb[12].mxu1 }
 0x2d5   :  { %v519_v42 = vmax.f32 %v4284_v40, 0.0  ;;  %v502_v43 = vpop.f32.mrb[13].mxu1 }
 0x2d6   :  { %v517_v44 = vmax.f32 %v502_v43, 0.0  ;;  %v4285_v45 = vpop.f32.mrb[14].mxu1 }
 0x2d7   :  { %v505_v46 = vpop.f32.mrb[15].mxu1  ;;  %v3498_v47 = vmul.f32 %v4991_v41, %v519_v42  ;;  %v520_v48 = vmax.f32 %v4285_v45, 0.0 }
 0x2d8   :  { %v3496_v50 = vmul.f32 %v4991_v41, %v517_v44  ;;  %v518_v55 = vmax.f32 %v505_v46, 0.0 }
 0x2d9   :  { %v3534_v49 = vsel %vm42_vm2, %v3498_v47, 0.0  ;;  %v3499_v58 = vmul.f32 %v4991_v41, %v520_v48 }
 0x2da   :  { %3535 = vadd.xlane.f32.xlu0 %v3534_v49  ;;  %v3528_v57 = vsel %vm42_vm2, %v3496_v50, 0.0  ;;  %v3497_v63 = vmul.f32 %v4991_v41, %v518_v55  ;;  %v4654_v49 = vld [vmem:[%s5588_s2 + $0x18] sm:$0xff]  }
 0x2db   :  { %v3537_v62 = vsel %vm42_vm2, %v3499_v58, 0.0 }
 0x2dc   :  { %v599_v51 = vpop.f32.mrb[16].mxu1  ;;  %v3531_v7 = vsel %vm42_vm2, %v3497_v63, 0.0 }
 0x2dd   :  { %v4296_v56 = vpop.f32.mrb[17].mxu1 }
 0x2de   :  { %3529 = vadd.xlane.f32.xlu0 %v3528_v57  ;;  %v602_v59 = vpop.f32.mrb[18].mxu1 }
 0x2df   :  { %v4297_v60 = vpop.f32.mrb[19].mxu1 }
 0x2e2   :  { %3538 = vadd.xlane.f32.xlu0 %v3537_v62  ;;  %v4655_v62 = vld [vmem:[%s5587_s1 + $0x20] sm:$0xff]  }
 0x2e4   :  { %v689_v0 = vpop.f32.mrb[20].mxu1 }
 0x2e5   :  { %v690_v1 = vadd.f32 %v689_v0, %v599_v51  ;;  %v4308_v5 = vpop.f32.mrb[21].mxu1 }
 0x2e6   :  { %v692_v9 = vpop.f32.mrb[22].mxu1  ;;  %3532 = vadd.xlane.f32.xlu0 %v3531_v7 }
 0x2e7   :  { %v695_v12 = vadd.f32 %v4916_v37, %v690_v1  ;;  %v4309_v13 = vpop.f32.mrb[23].mxu1 }
 0x2e9   :  { %v3914_v15 = vmul.f32 -1.442695, %v695_v12 }
 0x2eb   :  { %4693 = vpow2.f32 %v3914_v15 }
 0x2ec   :  { %v776_v16 = vpop.f32.mrb[24].mxu1 }
 0x2ed   :  { %v777_v17 = vadd.f32 %v4922_v53, %v776_v16  ;;  %v4320_v18 = vpop.f32.mrb[25].mxu1 }
 0x2ee   :  { %v779_v21 = vpop.f32.mrb[26].mxu1 }
 0x2ef   :  { %v782_v22 = vmul.f32 %v4692_v20, %v777_v17  ;;  %v4321_v23 = vpop.f32.mrb[27].mxu1 }
 0x2f1   :  { %v783_v24 = vadd.f32 %v782_v22, %v737_v19 }
 0x2f5   :  { %v4694_v25 = vpop.eup %4693 }
 0x2f6   :  { %v699_v27 = vadd.f32 1.0, %v4694_v25 }
 0x2f8   :  { %4695 = vrcp.f32 %v699_v27 }
 0x2f9   :  { %4697 = vtanh.f32 %v783_v24 }
 0x302   :  { %v4696_v28 = vpop.eup %4695 }
 0x303   :  { %v785_v29 = vsub.f32 1.0, %v4696_v28  ;;  %v4698_v30 = vpop.eup %4697  ;;  %v787_v33 = vmul.f32 %v4696_v28, %v4932_v4  ;;  %v3933_v4 = vld [vmem:[%s5586_s0 + $0x8] sm:$0xf] }
 0x305   :  { %v786_v31 = vmul.f32 %v4698_v30, %v785_v29 }
 0x307   :  { %v5005_v34 = vadd.f32 %v787_v33, %v786_v31 }
 0x309   :  { %v795_v32 = vpack.c.bf16 %v5005_v34, %v5005_v34 }
 0x30b   :  { %4637 = vmatprep.subr.msk.bf16.mxu0 %vm67_vm0, %v795_v32  ;;  %v818_v35 = vsel %vm67_vm0, %v795_v32, 0 }
 0x30c   :  { %4323 = vmatpush3.bf16.msra.mxu0 %v818_v35 }
 0x30d   :  { %4336 = vmatprep.subr.bf16.mxu0 %v4768_v2 }
 0x30f   :  { %4325 = vmatmul.mubr.msk.bf16.vlgmr.msra.gmra.mrb[28].mxu0 %vm42_vm2, %v4652_v36 }
 0x310   :  { %4337 = vmatpush3.bf16.msra.mxu0 %v4834_v3  ;;  %4338 = vmatprep.mubr.msk.bf16.mxu0 %vm4769_vm1, %v4768_v2 }
 0x311   :  { %4348 = vmatprep.subr.bf16.mxu0 %v4768_v2 }
 0x317   :  { %4339 = vmatmul.mubr.msk.bf16.vlgmr.msra.gmra.mrb[32].mxu0 %vm42_vm2, %v795_v32 }
 0x318   :  { %4349 = vmatpush3.bf16.msra.mxu0 %v4857_v8  ;;  %4350 = vmatprep.mubr.msk.bf16.mxu0 %vm4769_vm1, %v4768_v2 }
 0x319   :  { %4360 = vmatprep.subr.bf16.mxu0 %v4768_v2 }
 0x31f   :  { %4351 = vmatmul.mubr.msk.bf16.vlgmr.msra.gmra.mrb[36].mxu0 %vm42_vm2, %v3933_v4 }
 0x320   :  { %4361 = vmatpush3.bf16.msra.mxu0 %v4876_v14  ;;  %4362 = vmatprep.mubr.msk.bf16.mxu0 %vm4769_vm1, %v4768_v2 }
 0x327   :  { %4363 = vmatmul.mubr.msk.bf16.vlgmr.msra.gmra.mrb[40].mxu0 %vm42_vm2, %v3933_v4 }
 0x328   :  { %4374 = vmatprep.mubr.msk.bf16.mxu0 %vm42_vm2, %v4655_v62  ;;  %v4656_v62 = vld [vmem:[%s5587_s1 + $0x28] sm:$0xff]  }
 0x3e2   :  { %v4326_v39 = vpop.f32.mrb[28].mxu0 }
 0x3e3   :  { %v854_v40 = vpop.f32.mrb[29].mxu0 }
 0x3e4   :  { %v4327_v42 = vpop.f32.mrb[30].mxu0 }
 0x3e5   :  { %v875_v43 = vpack.c.bf16 %v4327_v42, %v4326_v39  ;;  %v857_v44 = vpop.f32.mrb[31].mxu0 }
 0x3e6   :  { %v874_v45 = vpack.c.bf16 %v857_v44, %v854_v40 }
 0x3e8   :  { %4328 = vmatprep.subr.bf16.mxu1 %v874_v45 }
 0x3e9   :  { %4329 = vmatpush3.bf16.msra.mxu1 %v874_v45 }
 0x3ea   :  { %4330 = vmatprep.subr.bf16.mxu1 %v875_v43  ;;  %v983_v46 = vpop.f32.mrb[32].mxu0 }
 0x3eb   :  { %v4340_v47 = vpop.f32.mrb[33].mxu0 }
 0x3ec   :  { %v986_v48 = vpop.f32.mrb[34].mxu0 }
 0x3ed   :  { %4331 = vmatpush3.bf16.msra.mxu1 %v875_v43  ;;  %v4341_v50 = vpop.f32.mrb[35].mxu0 }
 0x3ee   :  { %4342 = vmatprep.subr.bf16.mxu1 %v4768_v2 }
 0x3f0   :  { %4333 = vmatmul.mubr.msk.bf16.vlgmr.msra.gmra.mrb[28].mxu1 %vm461_vm3, %v4654_v49 }
 0x3f1   :  { %4343 = vmatpush3.bf16.msra.mxu1 %v4848_v6  ;;  %4344 = vmatprep.mubr.msk.bf16.mxu1 %vm4769_vm1, %v4768_v2 }
 0x3f2   :  { %v1066_v51 = vpop.f32.mrb[36].mxu0  ;;  %4354 = vmatprep.subr.bf16.mxu1 %v4768_v2 }
 0x3f3   :  { %v1067_v52 = vadd.f32 %v1066_v51, %v983_v46  ;;  %v4352_v55 = vpop.f32.mrb[37].mxu0 }
 0x3f4   :  { %v1069_v56 = vpop.f32.mrb[38].mxu0 }
 0x3f5   :  { %v4353_v57 = vpop.f32.mrb[39].mxu0  ;;  %v1072_v63 = vadd.f32 %v4910_v26, %v1067_v52 }
 0x3f7   :  { %v3937_v0 = vmul.f32 -1.442695, %v1072_v63  ;;  %v4657_v63 = vld [vmem:[%s5588_s2 + $0x20] sm:$0xff]  }
 0x3f8   :  { %4345 = vmatmul.mubr.msk.bf16.vlgmr.msra.gmra.mrb[32].mxu1 %vm42_vm2, %v795_v32 }
 0x3f9   :  { %4355 = vmatpush3.bf16.msra.mxu1 %v4865_v10  ;;  %4356 = vmatprep.mubr.msk.bf16.mxu1 %vm4769_vm1, %v4768_v2  ;;  %4699 = vpow2.f32 %v3937_v0 }
 0x3fa   :  { %4366 = vmatprep.subr.bf16.mxu1 %v4768_v2  ;;  %v1160_v58 = vpop.f32.mrb[40].mxu0 }
 0x3fb   :  { %v4364_v59 = vpop.f32.mrb[41].mxu0  ;;  %v1161_v44 = vadd.f32 %v4927_v54, %v1160_v58 }
 0x3fc   :  { %v1163_v60 = vpop.f32.mrb[42].mxu0 }
 0x3fd   :  { %v4365_v61 = vpop.f32.mrb[43].mxu0 }
 0x400   :  { %4357 = vmatmul.mubr.msk.bf16.vlgmr.msra.gmra.mrb[36].mxu1 %vm42_vm2, %v3933_v4 }
 0x401   :  { %4367 = vmatpush3.bf16.msra.mxu1 %v4868_v11  ;;  %4368 = vmatprep.mubr.msk.bf16.mxu1 %vm4769_vm1, %v4768_v2 }
 0x403   :  { %v4700_v20 = vpop.eup %4699 }
 0x404   :  { %v1076_v28 = vadd.f32 1.0, %v4700_v20 }
 0x406   :  { %4701 = vrcp.f32 %v1076_v28 }
 0x408   :  { %4369 = vmatmul.mubr.msk.bf16.vlgmr.msra.gmra.mrb[40].mxu1 %vm42_vm2, %v795_v32 }
 0x409   :  { %4382 = vmatprep.mubr.msk.bf16.mxu1 %vm461_vm3, %v4657_v63 }
 0x410   :  { %v4702_v45 = vpop.eup %4701 }
 0x4c3   :  { %v4334_v1 = vpop.f32.mrb[28].mxu1 }
 0x4c4   :  { %v943_v5 = vmax.f32 %v4334_v1, 0.0  ;;  %v926_v7 = vpop.f32.mrb[29].mxu1 }
 0x4c5   :  { %v941_v9 = vmax.f32 %v926_v7, 0.0  ;;  %v4335_v12 = vpop.f32.mrb[30].mxu1 }
 0x4c6   :  { %v929_v13 = vpop.f32.mrb[31].mxu1  ;;  %v3502_v15 = vmul.f32 %v4991_v41, %v943_v5  ;;  %v944_v16 = vmax.f32 %v4335_v12, 0.0 }
 0x4c7   :  { %v3500_v18 = vmul.f32 %v4991_v41, %v941_v9  ;;  %v942_v21 = vmax.f32 %v929_v13, 0.0 }
 0x4c8   :  { %v3546_v17 = vsel %vm42_vm2, %v3502_v15, 0.0  ;;  %v3503_v24 = vmul.f32 %v4991_v41, %v944_v16 }
 0x4c9   :  { %3547 = vadd.xlane.f32.xlu1 %v3546_v17  ;;  %v3540_v23 = vsel %vm42_vm2, %v3500_v18, 0.0  ;;  %v3501_v30 = vmul.f32 %v4991_v41, %v942_v21  ;;  %v4658_v17 = vld [vmem:[%s5588_s2 + $0x28] sm:$0xff]  }
 0x4ca   :  { %v3549_v29 = vsel %vm42_vm2, %v3503_v24, 0.0 }
 0x4cb   :  { %v1023_v19 = vpop.f32.mrb[32].mxu1  ;;  %v3543_v35 = vsel %vm42_vm2, %v3501_v30, 0.0 }
 0x4cc   :  { %v4346_v22 = vpop.f32.mrb[33].mxu1 }
 0x4cd   :  { %3541 = vadd.xlane.f32.xlu1 %v3540_v23  ;;  %v1026_v25 = vpop.f32.mrb[34].mxu1 }
 0x4ce   :  { %v4347_v27 = vpop.f32.mrb[35].mxu1 }
 0x4d1   :  { %3550 = vadd.xlane.f32.xlu1 %v3549_v29  ;;  %v4659_v29 = vld [vmem:[%s5587_s1 + $0x30] sm:$0xff]  }
 0x4d3   :  { %v1113_v31 = vpop.f32.mrb[36].mxu1 }
 0x4d4   :  { %v1114_v33 = vadd.f32 %v1113_v31, %v1023_v19  ;;  %v4358_v32 = vpop.f32.mrb[37].mxu1 }
 0x4d5   :  { %v1116_v36 = vpop.f32.mrb[38].mxu1  ;;  %3544 = vadd.xlane.f32.xlu1 %v3543_v35 }
 0x4d6   :  { %v1119_v4 = vadd.f32 %v4916_v37, %v1114_v33  ;;  %v4359_v38 = vpop.f32.mrb[39].mxu1 }
 0x4d8   :  { %v3939_v39 = vmul.f32 -1.442695, %v1119_v4 }
 0x4da   :  { %4703 = vpow2.f32 %v3939_v39 }
 0x4db   :  { %v1200_v40 = vpop.f32.mrb[40].mxu1 }
 0x4dc   :  { %v1201_v42 = vadd.f32 %v4922_v53, %v1200_v40  ;;  %v4370_v43 = vpop.f32.mrb[41].mxu1 }
 0x4dd   :  { %v1203_v46 = vpop.f32.mrb[42].mxu1 }
 0x4de   :  { %v1206_v47 = vmul.f32 %v4702_v45, %v1201_v42  ;;  %v4371_v48 = vpop.f32.mrb[43].mxu1 }
 0x4e0   :  { %v1207_v49 = vadd.f32 %v1206_v47, %v1161_v44 }
 0x4e4   :  { %v4704_v50 = vpop.eup %4703 }
 0x4e5   :  { %v1123_v51 = vadd.f32 1.0, %v4704_v50 }
 0x4e7   :  { %4705 = vrcp.f32 %v1123_v51 }
 0x4e8   :  { %4707 = vtanh.f32 %v1207_v49 }
 0x4f1   :  { %v4706_v52 = vpop.eup %4705 }
 0x4f2   :  { %v1209_v55 = vsub.f32 1.0, %v4706_v52  ;;  %v4708_v56 = vpop.eup %4707  ;;  %v1211_v59 = vmul.f32 %v4706_v52, %v5005_v34  ;;  %v3958_v34 = vld [vmem:[%s5586_s0 + $0xc] sm:$0xf] }
 0x4f4   :  { %v1210_v57 = vmul.f32 %v4708_v56, %v1209_v55 }
 0x4f6   :  { %v5073_v60 = vadd.f32 %v1211_v59, %v1210_v57 }
 0x4f8   :  { %v1219_v58 = vpack.c.bf16 %v5073_v60, %v5073_v60 }
 0x4fa   :  { %4638 = vmatprep.subr.msk.bf16.mxu0 %vm67_vm0, %v1219_v58  ;;  %v1242_v61 = vsel %vm67_vm0, %v1219_v58, 0 }
 0x4fb   :  { %4373 = vmatpush3.bf16.msra.mxu0 %v1242_v61 }
 0x4fc   :  { %4386 = vmatprep.subr.bf16.mxu0 %v4768_v2 }
 0x4fe   :  { %4375 = vmatmul.mubr.msk.bf16.vlgmr.msra.gmra.mrb[44].mxu0 %vm42_vm2, %v4656_v62 }
 0x4ff   :  { %4387 = vmatpush3.bf16.msra.mxu0 %v4834_v3  ;;  %4388 = vmatprep.mubr.msk.bf16.mxu0 %vm4769_vm1, %v4768_v2 }
 0x500   :  { %4398 = vmatprep.subr.bf16.mxu0 %v4768_v2 }
 0x506   :  { %4389 = vmatmul.mubr.msk.bf16.vlgmr.msra.gmra.mrb[48].mxu0 %vm42_vm2, %v1219_v58 }
 0x507   :  { %4399 = vmatpush3.bf16.msra.mxu0 %v4857_v8  ;;  %4400 = vmatprep.mubr.msk.bf16.mxu0 %vm4769_vm1, %v4768_v2 }
 0x508   :  { %4410 = vmatprep.subr.bf16.mxu0 %v4768_v2 }
 0x50e   :  { %4401 = vmatmul.mubr.msk.bf16.vlgmr.msra.gmra.mrb[52].mxu0 %vm42_vm2, %v3958_v34 }
 0x50f   :  { %4411 = vmatpush3.bf16.msra.mxu0 %v4876_v14  ;;  %4412 = vmatprep.mubr.msk.bf16.mxu0 %vm4769_vm1, %v4768_v2 }
 0x516   :  { %4413 = vmatmul.mubr.msk.bf16.vlgmr.msra.gmra.mrb[56].mxu0 %vm42_vm2, %v3958_v34 }
 0x517   :  { %4424 = vmatprep.mubr.msk.bf16.mxu0 %vm42_vm2, %v4659_v29  ;;  %v4660_v29 = vld [vmem:[%s5587_s1 + $0x38] sm:$0xff]  }
 0x5d1   :  { %v4376_v0 = vpop.f32.mrb[44].mxu0 }
 0x5d2   :  { %v1278_v1 = vpop.f32.mrb[45].mxu0 }
 0x5d3   :  { %v4377_v5 = vpop.f32.mrb[46].mxu0 }
 0x5d4   :  { %v1299_v7 = vpack.c.bf16 %v4377_v5, %v4376_v0  ;;  %v1281_v9 = vpop.f32.mrb[47].mxu0 }
 0x5d5   :  { %v1298_v12 = vpack.c.bf16 %v1281_v9, %v1278_v1 }
 0x5d7   :  { %4378 = vmatprep.subr.bf16.mxu1 %v1298_v12 }
 0x5d8   :  { %4379 = vmatpush3.bf16.msra.mxu1 %v1298_v12 }
 0x5d9   :  { %4380 = vmatprep.subr.bf16.mxu1 %v1299_v7  ;;  %v1407_v13 = vpop.f32.mrb[48].mxu0 }
 0x5da   :  { %v4390_v15 = vpop.f32.mrb[49].mxu0 }
 0x5db   :  { %v1410_v16 = vpop.f32.mrb[50].mxu0 }
 0x5dc   :  { %4381 = vmatpush3.bf16.msra.mxu1 %v1299_v7  ;;  %v4391_v18 = vpop.f32.mrb[51].mxu0 }
 0x5dd   :  { %4392 = vmatprep.subr.bf16.mxu1 %v4768_v2 }
 0x5df   :  { %4383 = vmatmul.mubr.msk.bf16.vlgmr.msra.gmra.mrb[44].mxu1 %vm461_vm3, %v4658_v17 }
 0x5e0   :  { %4393 = vmatpush3.bf16.msra.mxu1 %v4848_v6  ;;  %4394 = vmatprep.mubr.msk.bf16.mxu1 %vm4769_vm1, %v4768_v2 }
 0x5e1   :  { %v1490_v19 = vpop.f32.mrb[52].mxu0  ;;  %4404 = vmatprep.subr.bf16.mxu1 %v4768_v2 }
 0x5e2   :  { %v1491_v20 = vadd.f32 %v1490_v19, %v1407_v13  ;;  %v4402_v21 = vpop.f32.mrb[53].mxu0 }
 0x5e3   :  { %v1493_v22 = vpop.f32.mrb[54].mxu0 }
 0x5e4   :  { %v4403_v23 = vpop.f32.mrb[55].mxu0  ;;  %v1496_v30 = vadd.f32 %v4910_v26, %v1491_v20 }
 0x5e6   :  { %v3962_v31 = vmul.f32 -1.442695, %v1496_v30  ;;  %v4661_v30 = vld [vmem:[%s5588_s2 + $0x30] sm:$0xff]  }
 0x5e7   :  { %4395 = vmatmul.mubr.msk.bf16.vlgmr.msra.gmra.mrb[48].mxu1 %vm42_vm2, %v1219_v58 }
 0x5e8   :  { %4405 = vmatpush3.bf16.msra.mxu1 %v4865_v10  ;;  %4406 = vmatprep.mubr.msk.bf16.mxu1 %vm4769_vm1, %v4768_v2  ;;  %4709 = vpow2.f32 %v3962_v31 }
 0x5e9   :  { %4416 = vmatprep.subr.bf16.mxu1 %v4768_v2  ;;  %v1584_v24 = vpop.f32.mrb[56].mxu0 }
 0x5ea   :  { %v4414_v25 = vpop.f32.mrb[57].mxu0  ;;  %v1585_v9 = vadd.f32 %v4927_v54, %v1584_v24 }
 0x5eb   :  { %v1587_v27 = vpop.f32.mrb[58].mxu0 }
 0x5ec   :  { %v4415_v28 = vpop.f32.mrb[59].mxu0 }
 0x5ef   :  { %4407 = vmatmul.mubr.msk.bf16.vlgmr.msra.gmra.mrb[52].mxu1 %vm42_vm2, %v3958_v34 }
 0x5f0   :  { %4417 = vmatpush3.bf16.msra.mxu1 %v4868_v11  ;;  %4418 = vmatprep.mubr.msk.bf16.mxu1 %vm4769_vm1, %v4768_v2 }
 0x5f2   :  { %v4710_v49 = vpop.eup %4709 }
 0x5f3   :  { %v1500_v57 = vadd.f32 1.0, %v4710_v49 }
 0x5f5   :  { %4711 = vrcp.f32 %v1500_v57 }
 0x5f7   :  { %4419 = vmatmul.mubr.msk.bf16.vlgmr.msra.gmra.mrb[56].mxu1 %vm42_vm2, %v1219_v58 }
 0x5f8   :  { %4432 = vmatprep.mubr.msk.bf16.mxu1 %vm461_vm3, %v4661_v30 }
 0x5ff   :  { %v4712_v12 = vpop.eup %4711 }
 0x6b2   :  { %v4384_v33 = vpop.f32.mrb[44].mxu1 }
 0x6b3   :  { %v1367_v32 = vmax.f32 %v4384_v33, 0.0  ;;  %v1350_v35 = vpop.f32.mrb[45].mxu1 }
 0x6b4   :  { %v1365_v36 = vmax.f32 %v1350_v35, 0.0  ;;  %v4385_v4 = vpop.f32.mrb[46].mxu1 }
 0x6b5   :  { %v1368_v38 = vmax.f32 %v4385_v4, 0.0  ;;  %v1353_v39 = vpop.f32.mrb[47].mxu1  ;;  %v3506_v40 = vmul.f32 %v4991_v41, %v1367_v32 }
 0x6b6   :  { %v1366_v42 = vmax.f32 %v1353_v39, 0.0  ;;  %v3504_v45 = vmul.f32 %v4991_v41, %v1365_v36 }
 0x6b7   :  { %v3558_v43 = vsel %vm42_vm2, %v3506_v40, 0.0  ;;  %v3507_v44 = vmul.f32 %v4991_v41, %v1368_v38 }
 0x6b8   :  { %3559 = vadd.xlane.f32.xlu0 %v3558_v43  ;;  %v3505_v47 = vmul.f32 %v4991_v41, %v1366_v42  ;;  %v3552_v51 = vsel %vm42_vm2, %v3504_v45, 0.0  ;;  %v4662_v42 = vld [vmem:[%s5588_s2 + $0x38] sm:$0xff]  }
 0x6b9   :  { %v3561_v46 = vsel %vm42_vm2, %v3507_v44, 0.0 }
 0x6ba   :  { %v1447_v48 = vpop.f32.mrb[48].mxu1  ;;  %3562 = vadd.xlane.f32.xlu1 %v3561_v46  ;;  %v3555_v56 = vsel %vm42_vm2, %v3505_v47, 0.0 }
 0x6bb   :  { %v4396_v50 = vpop.f32.mrb[49].mxu1 }
 0x6bc   :  { %v1450_v52 = vpop.f32.mrb[50].mxu1  ;;  %3553 = vadd.xlane.f32.xlu0 %v3552_v51 }
 0x6bd   :  { %v4397_v55 = vpop.f32.mrb[51].mxu1 }
 0x6be   :  { %3556 = vadd.xlane.f32.xlu1 %v3555_v56  ;;  %v4663_v55 = vld [vmem:[%s5587_s1 + $0x40] sm:$0xff]  }
 0x6c2   :  { %v1537_v59 = vpop.f32.mrb[52].mxu1 }
 0x6c3   :  { %v1538_v58 = vadd.f32 %v1537_v59, %v1447_v48  ;;  %v4408_v61 = vpop.f32.mrb[53].mxu1 }
 0x6c4   :  { %v1540_v62 = vpop.f32.mrb[54].mxu1 }
 0x6c5   :  { %v1543_v34 = vadd.f32 %v4916_v37, %v1538_v58  ;;  %v4409_v63 = vpop.f32.mrb[55].mxu1 }
 0x6c7   :  { %v3964_v0 = vmul.f32 -1.442695, %v1543_v34 }
 0x6c9   :  { %4713 = vpow2.f32 %v3964_v0 }
 0x6ca   :  { %v1624_v1 = vpop.f32.mrb[56].mxu1 }
 0x6cb   :  { %v1625_v5 = vadd.f32 %v4922_v53, %v1624_v1  ;;  %v4420_v7 = vpop.f32.mrb[57].mxu1 }
 0x6cc   :  { %v1627_v13 = vpop.f32.mrb[58].mxu1 }
 0x6cd   :  { %v1630_v15 = vmul.f32 %v4712_v12, %v1625_v5  ;;  %v4421_v16 = vpop.f32.mrb[59].mxu1 }
 0x6cf   :  { %v1631_v17 = vadd.f32 %v1630_v15, %v1585_v9 }
 0x6d3   :  { %v4714_v18 = vpop.eup %4713 }
 0x6d4   :  { %v1547_v19 = vadd.f32 1.0, %v4714_v18 }
 0x6d6   :  { %4715 = vrcp.f32 %v1547_v19 }
 0x6d7   :  { %4717 = vtanh.f32 %v1631_v17 }
 0x6e0   :  { %v4716_v20 = vpop.eup %4715 }
 0x6e1   :  { %v1633_v21 = vsub.f32 1.0, %v4716_v20  ;;  %v4718_v22 = vpop.eup %4717  ;;  %v1635_v25 = vmul.f32 %v4716_v20, %v5073_v60  ;;  %v3983_v60 = vld [vmem:[%s5586_s0 + $0x10] sm:$0xf] }
 0x6e3   :  { %v1634_v23 = vmul.f32 %v4718_v22, %v1633_v21 }
 0x6e5   :  { %v5141_v27 = vadd.f32 %v1635_v25, %v1634_v23 }
 0x6e7   :  { %v1643_v24 = vpack.c.bf16 %v5141_v27, %v5141_v27 }
 0x6e9   :  { %4639 = vmatprep.subr.msk.bf16.mxu0 %vm67_vm0, %v1643_v24  ;;  %v1666_v28 = vsel %vm67_vm0, %v1643_v24, 0 }
 0x6ea   :  { %4423 = vmatpush3.bf16.msra.mxu0 %v1666_v28 }
 0x6eb   :  { %4436 = vmatprep.subr.bf16.mxu0 %v4768_v2 }
 0x6ed   :  { %4425 = vmatmul.mubr.msk.bf16.vlgmr.msra.gmra.mrb[60].mxu0 %vm42_vm2, %v4660_v29 }
 0x6ee   :  { %4437 = vmatpush3.bf16.msra.mxu0 %v4834_v3  ;;  %4438 = vmatprep.mubr.msk.bf16.mxu0 %vm4769_vm1, %v4768_v2 }
 0x6ef   :  { %4448 = vmatprep.subr.bf16.mxu0 %v4768_v2 }
 0x6f5   :  { %4439 = vmatmul.mubr.msk.bf16.vlgmr.msra.gmra.mrb[64].mxu0 %vm42_vm2, %v1643_v24 }
 0x6f6   :  { %4449 = vmatpush3.bf16.msra.mxu0 %v4857_v8  ;;  %4450 = vmatprep.mubr.msk.bf16.mxu0 %vm4769_vm1, %v4768_v2 }
 0x6f7   :  { %4460 = vmatprep.subr.bf16.mxu0 %v4768_v2 }
 0x6fd   :  { %4451 = vmatmul.mubr.msk.bf16.vlgmr.msra.gmra.mrb[68].mxu0 %vm42_vm2, %v3983_v60 }
 0x6fe   :  { %4461 = vmatpush3.bf16.msra.mxu0 %v4876_v14  ;;  %4462 = vmatprep.mubr.msk.bf16.mxu0 %vm4769_vm1, %v4768_v2 }
 0x705   :  { %4463 = vmatmul.mubr.msk.bf16.vlgmr.msra.gmra.mrb[72].mxu0 %vm42_vm2, %v3983_v60 }
 0x706   :  { %4474 = vmatprep.mubr.msk.bf16.mxu0 %vm42_vm2, %v4663_v55 }
 0x7c0   :  { %v4426_v31 = vpop.f32.mrb[60].mxu0 }
 0x7c1   :  { %v1702_v33 = vpop.f32.mrb[61].mxu0 }
 0x7c2   :  { %v4427_v32 = vpop.f32.mrb[62].mxu0 }
 0x7c3   :  { %v1723_v35 = vpack.c.bf16 %v4427_v32, %v4426_v31  ;;  %v1705_v36 = vpop.f32.mrb[63].mxu0 }
 0x7c4   :  { %v1722_v4 = vpack.c.bf16 %v1705_v36, %v1702_v33 }
 0x7c6   :  { %4428 = vmatprep.subr.bf16.mxu1 %v1722_v4 }
 0x7c7   :  { %4429 = vmatpush3.bf16.msra.mxu1 %v1722_v4 }
 0x7c8   :  { %4430 = vmatprep.subr.bf16.mxu1 %v1723_v35  ;;  %v1831_v38 = vpop.f32.mrb[64].mxu0 }
 0x7c9   :  { %v4440_v39 = vpop.f32.mrb[65].mxu0 }
 0x7ca   :  { %v1834_v40 = vpop.f32.mrb[66].mxu0 }
 0x7cb   :  { %4431 = vmatpush3.bf16.msra.mxu1 %v1723_v35  ;;  %v4441_v43 = vpop.f32.mrb[67].mxu0 }
 0x7cc   :  { %4442 = vmatprep.subr.bf16.mxu1 %v4768_v2 }
 0x7ce   :  { %4433 = vmatmul.mubr.msk.bf16.vlgmr.msra.gmra.mrb[60].mxu1 %vm461_vm3, %v4662_v42 }
 0x7cf   :  { %4443 = vmatpush3.bf16.msra.mxu1 %v4848_v6  ;;  %4444 = vmatprep.mubr.msk.bf16.mxu1 %vm4769_vm1, %v4768_v2 }
 0x7d0   :  { %v1914_v44 = vpop.f32.mrb[68].mxu0  ;;  %4454 = vmatprep.subr.bf16.mxu1 %v4768_v2 }
 0x7d1   :  { %v1915_v45 = vadd.f32 %v1914_v44, %v1831_v38  ;;  %v4452_v46 = vpop.f32.mrb[69].mxu0 }
 0x7d2   :  { %v1917_v47 = vpop.f32.mrb[70].mxu0 }
 0x7d3   :  { %v4453_v48 = vpop.f32.mrb[71].mxu0  ;;  %v1920_v56 = vadd.f32 %v4910_v26, %v1915_v45 }
 0x7d5   :  { %v3987_v57 = vmul.f32 -1.442695, %v1920_v56 }
 0x7d6   :  { %4445 = vmatmul.mubr.msk.bf16.vlgmr.msra.gmra.mrb[64].mxu1 %vm42_vm2, %v1643_v24 }
 0x7d7   :  { %4455 = vmatpush3.bf16.msra.mxu1 %v4865_v10  ;;  %4456 = vmatprep.mubr.msk.bf16.mxu1 %vm4769_vm1, %v4768_v2  ;;  %4719 = vpow2.f32 %v3987_v57 }
 0x7d8   :  { %4466 = vmatprep.subr.bf16.mxu1 %v4768_v2  ;;  %v2008_v49 = vpop.f32.mrb[72].mxu0 }
 0x7d9   :  { %v4464_v50 = vpop.f32.mrb[73].mxu0  ;;  %v2009_v35 = vadd.f32 %v4927_v54, %v2008_v49  ;;  %v4664_v49 = vld [vmem:[%s5587_s1 + $0x48] sm:$0xff]  }
 0x7da   :  { %v2011_v51 = vpop.f32.mrb[74].mxu0  ;;  %v4665_v50 = vld [vmem:[%s5588_s2 + $0x40] sm:$0xff]  }
 0x7db   :  { %v4465_v52 = vpop.f32.mrb[75].mxu0 }
 0x7de   :  { %4457 = vmatmul.mubr.msk.bf16.vlgmr.msra.gmra.mrb[68].mxu1 %vm42_vm2, %v3983_v60 }
 0x7df   :  { %4467 = vmatpush3.bf16.msra.mxu1 %v4868_v11  ;;  %4468 = vmatprep.mubr.msk.bf16.mxu1 %vm4769_vm1, %v4768_v2 }
 0x7e1   :  { %v4720_v17 = vpop.eup %4719 }
 0x7e2   :  { %v1924_v22 = vadd.f32 1.0, %v4720_v17  ;;  %v4739_v17 = vld [vmem:[%s5592_s6] ss:$0 sm:$0xff] }
 0x7e4   :  { %4721 = vrcp.f32 %v1924_v22 }
 0x7e6   :  { %4469 = vmatmul.mubr.msk.bf16.vlgmr.msra.gmra.mrb[72].mxu1 %vm42_vm2, %v1643_v24 }
 0x7e7   :  { %4482 = vmatprep.mubr.msk.bf16.mxu1 %vm461_vm3, %v4665_v50  ;;  %v4741_v50 = vld [vmem:[%s5592_s6 + $0x3] ss:$0 sm:$0xff] }
 0x7ee   :  { %v4722_v36 = vpop.eup %4721 }
 0x8a1   :  { %v4434_v59 = vpop.f32.mrb[60].mxu1 }
 0x8a2   :  { %v1791_v58 = vmax.f32 %v4434_v59, 0.0  ;;  %v1774_v61 = vpop.f32.mrb[61].mxu1 }
 0x8a3   :  { %v1789_v62 = vmax.f32 %v1774_v61, 0.0  ;;  %v4435_v34 = vpop.f32.mrb[62].mxu1 }
 0x8a4   :  { %v1792_v63 = vmax.f32 %v4435_v34, 0.0  ;;  %v1777_v0 = vpop.f32.mrb[63].mxu1  ;;  %v3510_v1 = vmul.f32 %v4991_v41, %v1791_v58  ;;  %v4666_v34 = vld [vmem:[%s5588_s2 + $0x48] sm:$0xff]  }
 0x8a5   :  { %v1790_v5 = vmax.f32 %v1777_v0, 0.0  ;;  %v3508_v7 = vmul.f32 %v4991_v41, %v1789_v62 }
 0x8a6   :  { %v3570_v9 = vsel %vm42_vm2, %v3510_v1, 0.0  ;;  %v3511_v13 = vmul.f32 %v4991_v41, %v1792_v63 }
 0x8a7   :  { %3571 = vadd.xlane.f32.xlu0 %v3570_v9  ;;  %v3564_v12 = vsel %vm42_vm2, %v3508_v7, 0.0  ;;  %v3509_v26 = vmul.f32 %v4991_v41, %v1790_v5 }
 0x8a8   :  { %3565 = vadd.xlane.f32.xlu1 %v3564_v12  ;;  %v3573_v20 = vsel %vm42_vm2, %v3511_v13, 0.0 }
 0x8a9   :  { %v1871_v15 = vpop.f32.mrb[64].mxu1  ;;  %v3567_v16 = vsel %vm42_vm2, %v3509_v26, 0.0 }
 0x8aa   :  { %v4446_v18 = vpop.f32.mrb[65].mxu1 }
 0x8ab   :  { %v1874_v19 = vpop.f32.mrb[66].mxu1  ;;  %3568 = vadd.xlane.f32.xlu0 %v3567_v16  ;;  %v4667_v16 = vld [vmem:[%s5587_s1 + $0x50] sm:$0xff]  }
 0x8ac   :  { %v4447_v21 = vpop.f32.mrb[67].mxu1  ;;  %3574 = vadd.xlane.f32.xlu1 %v3573_v20 }
 0x8b1   :  { %v1961_v23 = vpop.f32.mrb[68].mxu1 }
 0x8b2   :  { %v1962_v25 = vadd.f32 %v1961_v23, %v1871_v15  ;;  %v4458_v24 = vpop.f32.mrb[69].mxu1 }
 0x8b3   :  { %v1964_v28 = vpop.f32.mrb[70].mxu1 }
 0x8b4   :  { %v1967_v29 = vadd.f32 %v4916_v37, %v1962_v25  ;;  %v4459_v60 = vpop.f32.mrb[71].mxu1 }
 0x8b6   :  { %v3989_v30 = vmul.f32 -1.442695, %v1967_v29 }
 0x8b8   :  { %4723 = vpow2.f32 %v3989_v30 }
 0x8b9   :  { %v2048_v31 = vpop.f32.mrb[72].mxu1 }
 0x8ba   :  { %v2049_v33 = vadd.f32 %v4922_v53, %v2048_v31  ;;  %v4470_v32 = vpop.f32.mrb[73].mxu1 }
 0x8bb   :  { %v2051_v4 = vpop.f32.mrb[74].mxu1 }
 0x8bc   :  { %v2054_v38 = vmul.f32 %v4722_v36, %v2049_v33  ;;  %v4471_v39 = vpop.f32.mrb[75].mxu1 }
 0x8be   :  { %v2055_v40 = vadd.f32 %v2054_v38, %v2009_v35 }
 0x8c2   :  { %v4724_v42 = vpop.eup %4723 }
 0x8c3   :  { %v1971_v43 = vadd.f32 1.0, %v4724_v42 }
 0x8c5   :  { %4725 = vrcp.f32 %v1971_v43 }
 0x8c6   :  { %4727 = vtanh.f32 %v2055_v40 }
 0x8cf   :  { %v4726_v44 = vpop.eup %4725 }
 0x8d0   :  { %v2057_v37 = vsub.f32 1.0, %v4726_v44  ;;  %v4728_v45 = vpop.eup %4727  ;;  %v2059_v47 = vmul.f32 %v4726_v44, %v5141_v27  ;;  %v4008_v27 = vld [vmem:[%s5586_s0 + $0x14] sm:$0xf] }
 0x8d2   :  { %v2058_v46 = vmul.f32 %v4728_v45, %v2057_v37 }
 0x8d4   :  { %v5209_v48 = vadd.f32 %v2059_v47, %v2058_v46 }
 0x8d6   :  { %v2067_v53 = vpack.c.bf16 %v5209_v48, %v5209_v48 }
 0x8d8   :  { %4640 = vmatprep.subr.msk.bf16.mxu0 %vm67_vm0, %v2067_v53  ;;  %v2090_v54 = vsel %vm67_vm0, %v2067_v53, 0 }
 0x8d9   :  { %4473 = vmatpush3.bf16.msra.mxu0 %v2090_v54 }
 0x8da   :  { %4486 = vmatprep.subr.bf16.mxu0 %v4768_v2 }
 0x8dc   :  { %4475 = vmatmul.mubr.msk.bf16.vlgmr.msra.gmra.mrb[76].mxu0 %vm42_vm2, %v4664_v49 }
 0x8dd   :  { %4487 = vmatpush3.bf16.msra.mxu0 %v4834_v3  ;;  %4488 = vmatprep.mubr.msk.bf16.mxu0 %vm4769_vm1, %v4768_v2 }
 0x8de   :  { %4498 = vmatprep.subr.bf16.mxu0 %v4768_v2 }
 0x8e4   :  { %4489 = vmatmul.mubr.msk.bf16.vlgmr.msra.gmra.mrb[80].mxu0 %vm42_vm2, %v2067_v53 }
 0x8e5   :  { %4499 = vmatpush3.bf16.msra.mxu0 %v4857_v8  ;;  %4500 = vmatprep.mubr.msk.bf16.mxu0 %vm4769_vm1, %v4768_v2 }
 0x8e6   :  { %4510 = vmatprep.subr.bf16.mxu0 %v4768_v2 }
 0x8ec   :  { %4501 = vmatmul.mubr.msk.bf16.vlgmr.msra.gmra.mrb[84].mxu0 %vm42_vm2, %v4008_v27 }
 0x8ed   :  { %4511 = vmatpush3.bf16.msra.mxu0 %v4876_v14  ;;  %4512 = vmatprep.mubr.msk.bf16.mxu0 %vm4769_vm1, %v4768_v2 }
 0x8f4   :  { %4513 = vmatmul.mubr.msk.bf16.vlgmr.msra.gmra.mrb[88].mxu0 %vm42_vm2, %v4008_v27 }
 0x8f5   :  { %4524 = vmatprep.mubr.msk.bf16.mxu0 %vm42_vm2, %v4667_v16  ;;  %v4669_v16 = vld [vmem:[%s5587_s1 + $0x60] sm:$0xff]  }
 0x9af   :  { %v4476_v51 = vpop.f32.mrb[76].mxu0 }
 0x9b0   :  { %v2126_v52 = vpop.f32.mrb[77].mxu0 }
 0x9b1   :  { %v4477_v55 = vpop.f32.mrb[78].mxu0 }
 0x9b2   :  { %v2147_v56 = vpack.c.bf16 %v4477_v55, %v4476_v51  ;;  %v2129_v57 = vpop.f32.mrb[79].mxu0  ;;  %v4742_v55 = vld [vmem:[%s5592_s6 + $0x2] ss:$0 sm:$0xff] }
 0x9b3   :  { %v2146_v59 = vpack.c.bf16 %v2129_v57, %v2126_v52 }
 0x9b5   :  { %4478 = vmatprep.subr.bf16.mxu1 %v2146_v59 }
 0x9b6   :  { %4479 = vmatpush3.bf16.msra.mxu1 %v2146_v59 }
 0x9b7   :  { %4480 = vmatprep.subr.bf16.mxu1 %v2147_v56  ;;  %v2255_v58 = vpop.f32.mrb[80].mxu0 }
 0x9b8   :  { %v4490_v61 = vpop.f32.mrb[81].mxu0 }
 0x9b9   :  { %v2258_v62 = vpop.f32.mrb[82].mxu0 }
 0x9ba   :  { %4481 = vmatpush3.bf16.msra.mxu1 %v2147_v56  ;;  %v4491_v63 = vpop.f32.mrb[83].mxu0 }
 0x9bb   :  { %4492 = vmatprep.subr.bf16.mxu1 %v4768_v2 }
 0x9bd   :  { %4483 = vmatmul.mubr.msk.bf16.vlgmr.msra.gmra.mrb[76].mxu1 %vm461_vm3, %v4666_v34 }
 0x9be   :  { %4493 = vmatpush3.bf16.msra.mxu1 %v4848_v6  ;;  %4494 = vmatprep.mubr.msk.bf16.mxu1 %vm4769_vm1, %v4768_v2 }
 0x9bf   :  { %v2338_v0 = vpop.f32.mrb[84].mxu0  ;;  %4504 = vmatprep.subr.bf16.mxu1 %v4768_v2 }
 0x9c0   :  { %v2339_v1 = vadd.f32 %v2338_v0, %v2255_v58  ;;  %v4502_v5 = vpop.f32.mrb[85].mxu0 }
 0x9c1   :  { %v2341_v7 = vpop.f32.mrb[86].mxu0 }
 0x9c2   :  { %v4503_v9 = vpop.f32.mrb[87].mxu0  ;;  %v2344_v18 = vadd.f32 %v4739_v17, %v2339_v1  ;;  %v4670_v17 = vld [vmem:[%s5587_s1 + $0x68] sm:$0xff]  }
 0x9c4   :  { %v4012_v19 = vmul.f32 -1.442695, %v2344_v18  ;;  %v5343_v18 = vld [vmem:[%s5586_s0 + $0x1c] sm:$0xf] }
 0x9c5   :  { %4495 = vmatmul.mubr.msk.bf16.vlgmr.msra.gmra.mrb[80].mxu1 %vm42_vm2, %v2067_v53 }
 0x9c6   :  { %4505 = vmatpush3.bf16.msra.mxu1 %v4865_v10  ;;  %4506 = vmatprep.mubr.msk.bf16.mxu1 %vm4769_vm1, %v4768_v2  ;;  %4729 = vpow2.f32 %v4012_v19 }
 0x9c7   :  { %4516 = vmatprep.subr.bf16.mxu1 %v4768_v2  ;;  %v2432_v12 = vpop.f32.mrb[88].mxu0 }
 0x9c8   :  { %v4514_v26 = vpop.f32.mrb[89].mxu0  ;;  %v2433_v56 = vadd.f32 %v4742_v55, %v2432_v12 }
 0x9c9   :  { %v2435_v13 = vpop.f32.mrb[90].mxu0 }
 0x9ca   :  { %v4515_v15 = vpop.f32.mrb[91].mxu0 }
 0x9cb   :  { %v4668_v15 = vld [vmem:[%s5587_s1 + $0x58] sm:$0xff]  }
 0x9cd   :  { %4507 = vmatmul.mubr.msk.bf16.vlgmr.msra.gmra.mrb[84].mxu1 %vm42_vm2, %v4008_v27 }
 0x9ce   :  { %4517 = vmatpush3.bf16.msra.mxu1 %v4868_v11  ;;  %4518 = vmatprep.mubr.msk.bf16.mxu1 %vm4769_vm1, %v4768_v2 }
 0x9d0   :  { %v4730_v38 = vpop.eup %4729 }
 0x9d1   :  { %v2348_v44 = vadd.f32 1.0, %v4730_v38 }
 0x9d3   :  { %4731 = vrcp.f32 %v2348_v44 }
 0x9d5   :  { %4519 = vmatmul.mubr.msk.bf16.vlgmr.msra.gmra.mrb[88].mxu1 %vm42_vm2, %v2067_v53 }
 0x9dd   :  { %v4732_v57 = vpop.eup %4731 }
 0xa90   :  { %v4484_v20 = vpop.f32.mrb[76].mxu1 }
 0xa91   :  { %v2215_v21 = vmax.f32 %v4484_v20, 0.0  ;;  %v2198_v22 = vpop.f32.mrb[77].mxu1 }
 0xa92   :  { %v2213_v23 = vmax.f32 %v2198_v22, 0.0  ;;  %v4485_v25 = vpop.f32.mrb[78].mxu1 }
 0xa93   :  { %v2216_v24 = vmax.f32 %v4485_v25, 0.0  ;;  %v2201_v28 = vpop.f32.mrb[79].mxu1  ;;  %v3514_v29 = vmul.f32 %v4991_v41, %v2215_v21 }
 0xa94   :  { %v2214_v60 = vmax.f32 %v2201_v28, 0.0  ;;  %v3512_v30 = vmul.f32 %v4991_v41, %v2213_v23 }
 0xa95   :  { %v3582_v31 = vsel %vm42_vm2, %v3514_v29, 0.0  ;;  %v3515_v35 = vmul.f32 %v4991_v41, %v2216_v24 }
 0xa96   :  { %3583 = vadd.xlane.f32.xlu0 %v3582_v31  ;;  %v3576_v33 = vsel %vm42_vm2, %v3512_v30, 0.0  ;;  %v3513_v32 = vmul.f32 %v4991_v41, %v2214_v60  ;;  %v4740_v41 = vld [vmem:[%s5592_s6 + $0x1] ss:$0 sm:$0xff]  ;;  %v4674_v60 = vld [vmem:[%s5588_s2 + $0x58] sm:$0xff]  }
 0xa97   :  { %3577 = vadd.xlane.f32.xlu1 %v3576_v33  ;;  %v3585_v42 = vsel %vm42_vm2, %v3515_v35, 0.0 }
 0xa98   :  { %v2295_v36 = vpop.f32.mrb[80].mxu1  ;;  %v3579_v4 = vsel %vm42_vm2, %v3513_v32, 0.0 }
 0xa99   :  { %v4496_v39 = vpop.f32.mrb[81].mxu1 }
 0xa9a   :  { %v2298_v40 = vpop.f32.mrb[82].mxu1  ;;  %3580 = vadd.xlane.f32.xlu0 %v3579_v4 }
 0xa9b   :  { %v4497_v43 = vpop.f32.mrb[83].mxu1  ;;  %3586 = vadd.xlane.f32.xlu1 %v3585_v42 }
 0xaa0   :  { %v2385_v37 = vpop.f32.mrb[84].mxu1 }
 0xaa1   :  { %v2386_v45 = vadd.f32 %v2385_v37, %v2295_v36  ;;  %v4508_v46 = vpop.f32.mrb[85].mxu1 }
 0xaa2   :  { %v2388_v47 = vpop.f32.mrb[86].mxu1 }
 0xaa3   :  { %v2391_v53 = vadd.f32 %v4740_v41, %v2386_v45  ;;  %v4509_v54 = vpop.f32.mrb[87].mxu1  ;;  %v4675_v45 = vld [vmem:[%s5588_s2 + $0x60] sm:$0xff]  }
 0xaa4   :  { %v4676_v54 = vld [vmem:[%s5588_s2 + $0x68] sm:$0xff]  }
 0xaa5   :  { %v4014_v49 = vmul.f32 -1.442695, %v2391_v53 }
 0xaa7   :  { %4733 = vpow2.f32 %v4014_v49 }
 0xaa8   :  { %v2472_v27 = vpop.f32.mrb[88].mxu1 }
 0xaa9   :  { %v2473_v51 = vadd.f32 %v4741_v50, %v2472_v27  ;;  %v4520_v52 = vpop.f32.mrb[89].mxu1 }
 0xaaa   :  { %v2475_v59 = vpop.f32.mrb[90].mxu1 }
 0xaab   :  { %v2478_v58 = vmul.f32 %v4732_v57, %v2473_v51  ;;  %v4521_v61 = vpop.f32.mrb[91].mxu1 }
 0xaad   :  { %v2479_v62 = vadd.f32 %v2478_v58, %v2433_v56 }
 0xab1   :  { %v4734_v34 = vpop.eup %4733 }
 0xab2   :  { %v2395_v63 = vadd.f32 1.0, %v4734_v34  ;;  %v4677_v34 = vld [vmem:[%s5588_s2 + $0x70] sm:$0xff]  }
 0xab4   :  { %4735 = vrcp.f32 %v2395_v63 }
 0xab5   :  { %4737 = vtanh.f32 %v2479_v62 }
 0xabe   :  { %v4736_v0 = vpop.eup %4735 }
 0xabf   :  { %v2481_v1 = vsub.f32 1.0, %v4736_v0  ;;  %v4738_v5 = vpop.eup %4737  ;;  %v2483_v7 = vmul.f32 %v4736_v0, %v5209_v48  ;;  %v5310_v48 = vld [vmem:[%s5586_s0 + $0x18] sm:$0xf] }
 0xac1   :  { %v2482_v9 = vmul.f32 %v4738_v5, %v2481_v1 }
 0xac3   :  { %v2484_v26 = vadd.f32 %v2483_v7, %v2482_v9 }
 0xac5   :  { %v5285_v13 = vpack.c.bf16 %v2484_v26, %v2484_v26  ;;  %3489 = vst.msk [vmem:[#allocation3] sm:$0xff] %vm42_vm2, %v2484_v26 }
 0xac7   :  { %4641 = vmatprep.subr.msk.bf16.mxu0 %vm67_vm0, %v5285_v13  ;;  %v2514_v12 = vsel %vm67_vm0, %v5285_v13, 0 }
 0xac8   :  { %4523 = vmatpush3.bf16.msra.mxu0 %v2514_v12 }
 0xac9   :  { %4536 = vmatprep.subr.bf16.mxu0 %v4768_v2 }
 0xacb   :  { %4525 = vmatmul.mubr.msk.bf16.vlgmr.msra.gmra.mrb[92].mxu0 %vm42_vm2, %v4668_v15 }
 0xacc   :  { %4537 = vmatpush3.bf16.msra.mxu0 %v4834_v3  ;;  %4538 = vmatprep.mubr.msk.bf16.mxu0 %vm4769_vm1, %v4768_v2 }
 0xacd   :  { %4548 = vmatprep.subr.bf16.mxu0 %v4768_v2 }
 0xad3   :  { %4539 = vmatmul.mubr.msk.bf16.vlgmr.msra.gmra.mrb[96].mxu0 %vm42_vm2, %v5285_v13 }
 0xad4   :  { %4549 = vmatpush3.bf16.msra.mxu0 %v4857_v8  ;;  %4550 = vmatprep.mubr.msk.bf16.mxu0 %vm4769_vm1, %v4768_v2 }
 0xad5   :  { %4560 = vmatprep.subr.bf16.mxu0 %v4768_v2 }
 0xadb   :  { %4551 = vmatmul.mubr.msk.bf16.vlgmr.msra.gmra.mrb[100].mxu0 %vm42_vm2, %v5310_v48 }
 0xadc   :  { %4561 = vmatpush3.bf16.msra.mxu0 %v4876_v14  ;;  %4562 = vmatprep.mubr.msk.bf16.mxu0 %vm4769_vm1, %v4768_v2 }
 0xadd   :  { %4642 = vmatprep.subr.msk.bf16.mxu0 %vm67_vm0, %v5285_v13 }
 0xae3   :  { %4563 = vmatmul.mubr.msk.bf16.vlgmr.msra.gmra.mrb[104].mxu0 %vm42_vm2, %v5310_v48 }
 0xae4   :  { %4573 = vmatpush3.bf16.msra.mxu0 %v2514_v12  ;;  %4574 = vmatprep.mubr.msk.bf16.mxu0 %vm42_vm2, %v4669_v16 }
 0xae5   :  { %4586 = vmatprep.subr.bf16.mxu0 %v4768_v2 }
 0xaeb   :  { %4575 = vmatmul.mubr.msk.bf16.vlgmr.msra.gmra.mrb[108].mxu0 %vm42_vm2, %v4670_v17 }
 0xaec   :  { %4587 = vmatpush3.bf16.msra.mxu0 %v4834_v3  ;;  %4588 = vmatprep.mubr.msk.bf16.mxu0 %vm4769_vm1, %v4768_v2  ;;  %v4671_v3 = vld [vmem:[%s5587_s1 + $0x70] sm:$0xff]  }
 0xaed   :  { %4598 = vmatprep.subr.bf16.mxu0 %v4768_v2 }
 0xaf3   :  { %4589 = vmatmul.mubr.msk.bf16.vlgmr.msra.gmra.mrb[112].mxu0 %vm42_vm2, %v5285_v13 }
 0xaf4   :  { %4599 = vmatpush3.bf16.msra.mxu0 %v4857_v8  ;;  %4600 = vmatprep.mubr.msk.bf16.mxu0 %vm4769_vm1, %v4768_v2  ;;  %v4672_v8 = vld [vmem:[%s5587_s1 + $0x78] sm:$0xff]  }
 0xaf5   :  { %4610 = vmatprep.subr.bf16.mxu0 %v4768_v2 }
 0xafb   :  { %4601 = vmatmul.mubr.msk.bf16.vlgmr.msra.gmra.mrb[116].mxu0 %vm42_vm2, %v5343_v18 }
 0xafc   :  { %4611 = vmatpush3.bf16.msra.mxu0 %v4876_v14  ;;  %4612 = vmatprep.mubr.msk.bf16.mxu0 %vm4769_vm1, %v4768_v2  ;;  %v4673_v14 = vld [vmem:[%s5588_s2 + $0x50] sm:$0xff]  }
 0xafd   :  { %4643 = vmatprep.subr.msk.bf16.mxu0 %vm67_vm0, %v5285_v13  ;;  %4532 = vmatprep.mubr.msk.bf16.mxu1 %vm461_vm3, %v4673_v14 }
 0xb03   :  { %4613 = vmatmul.mubr.msk.bf16.vlgmr.msra.gmra.mrb[120].mxu0 %vm42_vm2, %v5343_v18 }
 0xb04   :  { %4623 = vmatpush3.bf16.msra.mxu0 %v2514_v12  ;;  %4624 = vmatprep.mubr.msk.bf16.mxu0 %vm42_vm2, %v4671_v3 }
 0xb0b   :  { %4625 = vmatmul.mubr.msk.bf16.vlgmr.msra.gmra.mrb[124].mxu0 %vm42_vm2, %v4672_v8 }
 0xb9e   :  { %v4526_v19 = vpop.f32.mrb[92].mxu0 }
 0xb9f   :  { %v2550_v20 = vpop.f32.mrb[93].mxu0 }
 0xba0   :  { %v4527_v21 = vpop.f32.mrb[94].mxu0 }
 0xba1   :  { %v2571_v22 = vpack.c.bf16 %v4527_v21, %v4526_v19  ;;  %v2553_v23 = vpop.f32.mrb[95].mxu0 }
 0xba2   :  { %v2570_v25 = vpack.c.bf16 %v2553_v23, %v2550_v20 }
 0xba4   :  { %4528 = vmatprep.subr.bf16.mxu1 %v2570_v25 }
 0xba5   :  { %4529 = vmatpush3.bf16.msra.mxu1 %v2570_v25 }
 0xba6   :  { %4530 = vmatprep.subr.bf16.mxu1 %v2571_v22  ;;  %v2679_v24 = vpop.f32.mrb[96].mxu0 }
 0xba7   :  { %v4540_v28 = vpop.f32.mrb[97].mxu0 }
 0xba8   :  { %v2682_v29 = vpop.f32.mrb[98].mxu0 }
 0xba9   :  { %4531 = vmatpush3.bf16.msra.mxu1 %v2571_v22  ;;  %v4541_v30 = vpop.f32.mrb[99].mxu0 }
 0xbaa   :  { %4542 = vmatprep.subr.bf16.mxu1 %v4768_v2 }
 0xbac   :  { %4533 = vmatmul.mubr.msk.bf16.vlgmr.msra.gmra.mrb[92].mxu1 %vm461_vm3, %v4674_v60 }
 0xbad   :  { %4543 = vmatpush3.bf16.msra.mxu1 %v4848_v6  ;;  %4544 = vmatprep.mubr.msk.bf16.mxu1 %vm4769_vm1, %v4768_v2 }
 0xbae   :  { %v2762_v31 = vpop.f32.mrb[100].mxu0  ;;  %4554 = vmatprep.subr.bf16.mxu1 %v4768_v2 }
 0xbaf   :  { %v4552_v33 = vpop.f32.mrb[101].mxu0 }
 0xbb0   :  { %v2765_v32 = vpop.f32.mrb[102].mxu0 }
 0xbb1   :  { %v4553_v35 = vpop.f32.mrb[103].mxu0 }
 0xbb4   :  { %4545 = vmatmul.mubr.msk.bf16.vlgmr.msra.gmra.mrb[96].mxu1 %vm42_vm2, %v5285_v13 }
 0xbb5   :  { %4555 = vmatpush3.bf16.msra.mxu1 %v4865_v10  ;;  %4556 = vmatprep.mubr.msk.bf16.mxu1 %vm4769_vm1, %v4768_v2 }
 0xbb6   :  { %v2856_v36 = vpop.f32.mrb[104].mxu0  ;;  %4566 = vmatprep.subr.bf16.mxu1 %v4768_v2 }
 0xbb7   :  { %v4564_v4 = vpop.f32.mrb[105].mxu0 }
 0xbb8   :  { %v2859_v38 = vpop.f32.mrb[106].mxu0 }
 0xbb9   :  { %v4565_v39 = vpop.f32.mrb[107].mxu0 }
 0xbbc   :  { %4557 = vmatmul.mubr.msk.bf16.vlgmr.msra.gmra.mrb[100].mxu1 %vm42_vm2, %v5310_v48 }
 0xbbd   :  { %4567 = vmatpush3.bf16.msra.mxu1 %v4868_v11  ;;  %4568 = vmatprep.mubr.msk.bf16.mxu1 %vm4769_vm1, %v4768_v2 }
 0xbbe   :  { %v4576_v40 = vpop.f32.mrb[108].mxu0 }
 0xbbf   :  { %v2974_v42 = vpop.f32.mrb[109].mxu0 }
 0xbc0   :  { %v4577_v43 = vpop.f32.mrb[110].mxu0 }
 0xbc1   :  { %v2995_v44 = vpack.c.bf16 %v4577_v43, %v4576_v40  ;;  %v2977_v37 = vpop.f32.mrb[111].mxu0 }
 0xbc2   :  { %v2994_v46 = vpack.c.bf16 %v2977_v37, %v2974_v42 }
 0xbc4   :  { %4569 = vmatmul.mubr.msk.bf16.vlgmr.msra.gmra.mrb[104].mxu1 %vm42_vm2, %v5285_v13  ;;  %4578 = vmatprep.subr.bf16.mxu1 %v2994_v46 }
 0xbc5   :  { %4579 = vmatpush3.bf16.msra.mxu1 %v2994_v46  ;;  %4582 = vmatprep.mubr.msk.bf16.mxu1 %vm461_vm3, %v4675_v45 }
 0xbc6   :  { %4580 = vmatprep.subr.bf16.mxu1 %v2995_v44  ;;  %v3103_v47 = vpop.f32.mrb[112].mxu0 }
 0xbc7   :  { %v4590_v41 = vpop.f32.mrb[113].mxu0 }
 0xbc8   :  { %v3106_v53 = vpop.f32.mrb[114].mxu0 }
 0xbc9   :  { %4581 = vmatpush3.bf16.msra.mxu1 %v2995_v44  ;;  %v4591_v49 = vpop.f32.mrb[115].mxu0 }
 0xbca   :  { %4592 = vmatprep.subr.bf16.mxu1 %v4768_v2 }
 0xbcc   :  { %4583 = vmatmul.mubr.msk.bf16.vlgmr.msra.gmra.mrb[108].mxu1 %vm461_vm3, %v4676_v54 }
 0xbcd   :  { %4593 = vmatpush3.bf16.msra.mxu1 %v4848_v6  ;;  %4594 = vmatprep.mubr.msk.bf16.mxu1 %vm4769_vm1, %v4768_v2 }
 0xbce   :  { %v3186_v27 = vpop.f32.mrb[116].mxu0  ;;  %4604 = vmatprep.subr.bf16.mxu1 %v4768_v2 }
 0xbcf   :  { %v4602_v50 = vpop.f32.mrb[117].mxu0 }
 0xbd0   :  { %v3189_v51 = vpop.f32.mrb[118].mxu0 }
 0xbd1   :  { %v4603_v52 = vpop.f32.mrb[119].mxu0 }
 0xbd4   :  { %4595 = vmatmul.mubr.msk.bf16.vlgmr.msra.gmra.mrb[112].mxu1 %vm42_vm2, %v5285_v13 }
 0xbd5   :  { %4605 = vmatpush3.bf16.msra.mxu1 %v4865_v10  ;;  %4606 = vmatprep.mubr.msk.bf16.mxu1 %vm4769_vm1, %v4768_v2 }
 0xbd6   :  { %v3280_v55 = vpop.f32.mrb[120].mxu0  ;;  %4616 = vmatprep.subr.bf16.mxu1 %v4768_v2 }
 0xbd7   :  { %v4614_v6 = vpop.f32.mrb[121].mxu0 }
 0xbd8   :  { %v3283_v56 = vpop.f32.mrb[122].mxu0 }
 0xbd9   :  { %v4615_v57 = vpop.f32.mrb[123].mxu0 }
 0xbdc   :  { %4607 = vmatmul.mubr.msk.bf16.vlgmr.msra.gmra.mrb[116].mxu1 %vm42_vm2, %v5343_v18 }
 0xbdd   :  { %4617 = vmatpush3.bf16.msra.mxu1 %v4868_v11  ;;  %4618 = vmatprep.mubr.msk.bf16.mxu1 %vm4769_vm1, %v4768_v2  ;;  %v4678_v2 = vld [vmem:[%s5588_s2 + $0x78] sm:$0xff]   ;;  %s4770_s2 = smov [#allocation3]  }
 0xbde   :  { %v4626_v59 = vpop.f32.mrb[124].mxu0 }
 0xbdf   :  { %v3398_v58 = vpop.f32.mrb[125].mxu0 }
 0xbe0   :  { %v4627_v10 = vpop.f32.mrb[126].mxu0 }
 0xbe1   :  { %v3419_v61 = vpack.c.bf16 %v4627_v10, %v4626_v59  ;;  %v3401_v62 = vpop.f32.mrb[127].mxu0 }
 0xbe2   :  { %v3418_v63 = vpack.c.bf16 %v3401_v62, %v3398_v58 }
 0xbe4   :  { %4619 = vmatmul.mubr.msk.bf16.vlgmr.msra.gmra.mrb[120].mxu1 %vm42_vm2, %v5285_v13  ;;  %4628 = vmatprep.subr.bf16.mxu1 %v3418_v63  ;;  %v5425_v13 = vld [vmem:[%s5593_s7] ss:$0 sm:$0xff]  ;;  %s3874_s7 = sshll.u32 %s4770_s2, 4  ;;  %s3875_s7 = int_to_ptr.vmem [resolvable:$true] %s3874_s7 }
 0xbe5   :  { %4629 = vmatpush3.bf16.msra.mxu1 %v3418_v63  ;;  %4632 = vmatprep.mubr.msk.bf16.mxu1 %vm461_vm3, %v4677_v34  ;;  %s4744_s28 = scalar_lea.vmem %s3875_s7, 128  ;;  %p4749_p1 = scmp.lt.s32.totalorder %s3875_s7, %s3875_s7 }
 0xbe6   :  { %4630 = vmatprep.subr.bf16.mxu1 %v3419_v61  ;;  %p4745_p0 = scmp.ne.s32.totalorder %s3875_s7, %s4744_s28  ;;  %p4750_p2 = scmp.lt.s32.totalorder %s4744_s28, %s4744_s28 }
 0xbe8   :  { %p4751_p3 = por %p4750_p2, %p4749_p1 }
 0xbe9   :  { %4631 = vmatpush3.bf16.msra.mxu1 %v3419_v61 }
 0xbea   :  { %p4752_p4 = pnand %p4751_p3, %p4745_p0 }
 0xbec   :  { %4633 = vmatmul.mubr.msk.bf16.vlgmr.msra.gmra.mrb[124].mxu1 %vm461_vm3, %v4678_v2 }
 0xc7f   :  { %v4534_v11 = vpop.f32.mrb[92].mxu1 }
 0xc80   :  { %v2639_v0 = vmax.f32 %v4534_v11, 0.0  ;;  %v2622_v1 = vpop.f32.mrb[93].mxu1 }
 0xc81   :  { %v2637_v5 = vmax.f32 %v2622_v1, 0.0  ;;  %v4535_v7 = vpop.f32.mrb[94].mxu1 }
 0xc82   :  { %v2640_v9 = vmax.f32 %v4535_v7, 0.0  ;;  %v2625_v26 = vpop.f32.mrb[95].mxu1  ;;  %v3518_v12 = vmul.f32 %v5425_v13, %v2639_v0 }
 0xc83   :  { %v2638_v15 = vmax.f32 %v2625_v26, 0.0  ;;  %v3516_v48 = vmul.f32 %v5425_v13, %v2637_v5 }
 0xc84   :  { %v3594_v16 = vsel %vm42_vm2, %v3518_v12, 0.0  ;;  %v3519_v3 = vmul.f32 %v5425_v13, %v2640_v9 }
 0xc85   :  { %3595 = vadd.xlane.f32.xlu0 %v3594_v16  ;;  %v3588_v17 = vsel %vm42_vm2, %v3516_v48, 0.0  ;;  %v3517_v18 = vmul.f32 %v5425_v13, %v2638_v15 }
 0xc86   :  { %3589 = vadd.xlane.f32.xlu1 %v3588_v17  ;;  %v3597_v21 = vsel %vm42_vm2, %v3519_v3, 0.0 }
 0xc87   :  { %v2719_v8 = vpop.f32.mrb[96].mxu1  ;;  %v3591_v14 = vsel %vm42_vm2, %v3517_v18, 0.0 }
 0xc88   :  { %v4546_v19 = vpop.f32.mrb[97].mxu1 }
 0xc89   :  { %v2722_v20 = vpop.f32.mrb[98].mxu1  ;;  %3592 = vadd.xlane.f32.xlu0 %v3591_v14 }
 0xc8a   :  { %v4547_v22 = vpop.f32.mrb[99].mxu1  ;;  %3598 = vadd.xlane.f32.xlu1 %v3597_v21 }
 0xc8f   :  { %v2809_v23 = vpop.f32.mrb[100].mxu1 }
 0xc90   :  { %v4558_v25 = vpop.f32.mrb[101].mxu1 }
 0xc91   :  { %v2812_v24 = vpop.f32.mrb[102].mxu1 }
 0xc92   :  { %v4559_v28 = vpop.f32.mrb[103].mxu1 }
 0xc97   :  { %v2896_v29 = vpop.f32.mrb[104].mxu1 }
 0xc98   :  { %v4570_v60 = vpop.f32.mrb[105].mxu1 }
 0xc99   :  { %v2899_v30 = vpop.f32.mrb[106].mxu1 }
 0xc9a   :  { %v4571_v31 = vpop.f32.mrb[107].mxu1 }
 0xc9f   :  { %v4584_v33 = vpop.f32.mrb[108].mxu1 }
 0xca0   :  { %v3063_v32 = vmax.f32 %v4584_v33, 0.0  ;;  %v3046_v35 = vpop.f32.mrb[109].mxu1 }
 0xca1   :  { %v3061_v36 = vmax.f32 %v3046_v35, 0.0  ;;  %v4585_v4 = vpop.f32.mrb[110].mxu1 }
 0xca2   :  { %v3064_v38 = vmax.f32 %v4585_v4, 0.0  ;;  %v3049_v39 = vpop.f32.mrb[111].mxu1  ;;  %v3522_v40 = vmul.f32 %v5425_v13, %v3063_v32 }
 0xca3   :  { %v3062_v42 = vmax.f32 %v3049_v39, 0.0  ;;  %v3520_v43 = vmul.f32 %v5425_v13, %v3061_v36 }
 0xca4   :  { %v3606_v44 = vsel %vm42_vm2, %v3522_v40, 0.0  ;;  %v3523_v46 = vmul.f32 %v5425_v13, %v3064_v38 }
 0xca5   :  { %3607 = vadd.xlane.f32.xlu0 %v3606_v44  ;;  %v3600_v37 = vsel %vm42_vm2, %v3520_v43, 0.0  ;;  %v3521_v45 = vmul.f32 %v5425_v13, %v3062_v42 }
 0xca6   :  { %3601 = vadd.xlane.f32.xlu1 %v3600_v37  ;;  %v3609_v49 = vsel %vm42_vm2, %v3523_v46, 0.0 }
 0xca7   :  { %v3143_v47 = vpop.f32.mrb[112].mxu1  ;;  %v3603_v41 = vsel %vm42_vm2, %v3521_v45, 0.0 }
 0xca8   :  { %v4596_v53 = vpop.f32.mrb[113].mxu1 }
 0xca9   :  { %v3146_v54 = vpop.f32.mrb[114].mxu1  ;;  %3604 = vadd.xlane.f32.xlu0 %v3603_v41 }
 0xcaa   :  { %v4597_v27 = vpop.f32.mrb[115].mxu1  ;;  %3610 = vadd.xlane.f32.xlu1 %v3609_v49 }
 0xcaf   :  { %v3233_v50 = vpop.f32.mrb[116].mxu1 }
 0xcb0   :  { %v4608_v51 = vpop.f32.mrb[117].mxu1 }
 0xcb1   :  { %v3236_v52 = vpop.f32.mrb[118].mxu1 }
 0xcb2   :  { %v4609_v55 = vpop.f32.mrb[119].mxu1 }
 0xcb7   :  { %v3320_v6 = vpop.f32.mrb[120].mxu1 }
 0xcb8   :  { %v4620_v56 = vpop.f32.mrb[121].mxu1 }
 0xcb9   :  { %v3323_v57 = vpop.f32.mrb[122].mxu1 }
 0xcba   :  { %v4621_v59 = vpop.f32.mrb[123].mxu1 }
 0xcbf   :  { %v4634_v58 = vpop.f32.mrb[124].mxu1 }
 0xcc0   :  { %v3470_v10 = vpop.f32.mrb[125].mxu1  ;;  %v3487_v2 = vmax.f32 %v4634_v58, 0.0 }
 0xcc1   :  { %v3485_v61 = vmax.f32 %v3470_v10, 0.0  ;;  %v4635_v62 = vpop.f32.mrb[126].mxu1 }
 0xcc2   :  { %v3488_v34 = vmax.f32 %v4635_v62, 0.0  ;;  %v3473_v63 = vpop.f32.mrb[127].mxu1  ;;  %v3526_v26 = vmul.f32 %v5425_v13, %v3487_v2 }
 0xcc3   :  { %v3486_v11 = vmax.f32 %v3473_v63, 0.0  ;;  %v3524_v0 = vmul.f32 %v5425_v13, %v3485_v61 }
 0xcc4   :  { %v3527_v7 = vmul.f32 %v5425_v13, %v3488_v34  ;;  %v3618_v15 = vsel %vm42_vm2, %v3526_v26, 0.0 }
 0xcc5   :  { %v3525_v1 = vmul.f32 %v5425_v13, %v3486_v11  ;;  %v3612_v5 = vsel %vm42_vm2, %v3524_v0, 0.0 }
 0xcc6   :  { %3613 = vadd.xlane.f32.xlu1 %v3612_v5  ;;  %v3621_v12 = vsel %vm42_vm2, %v3527_v7, 0.0 }
 0xcc7   :  { %v3615_v9 = vsel %vm42_vm2, %v3525_v1, 0.0 }
 0xcc8   :  { %3616 = vadd.xlane.f32.xlu0 %v3615_v9 }
 0xcca   :  { %3622 = vadd.xlane.f32.xlu1 %v3621_v12 }
 0xccc   :  { %3619 = vadd.xlane.f32.xlu0 %v3618_v15 }
 0xccd   :  { %4755 = shalt.err (!%p4752_p4)
}
 0xcce   :  { %s4756_s11 = scalar_lea.hbm %s5596_s10, 128 }
 0xccf   :  { %p4757_p5 = scmp.ne.s32.totalorder %s5596_s10, %s4756_s11  ;;  %p4760_p6 = scmp.lt.u32.totalorder %s4756_s11, %s5596_s10 }
 0xcd1   :  { %p4762_p7 = pnand %p4760_p6, %p4757_p5 }
 0xcd3   :  { %4765 = shalt.err (!%p4762_p7)
}
 0xcd4   :  { %3877 = dma.vmem_to_hbm [thread:$0]  %s3875_s7, 128, %s5596_s10, [#allocation4]   ;;  %v3536_v13 = vpop.xlane.xlu0 %3535  ;;  %v3548_v48 = vpop.xlane.xlu1 %3547  ;;  %v3689_v60 = vlaneseq  ;;  %v5476_v38 = vstv %s5594_s8  ;;  %vm3700_vm4 = vcmask 130112   ;;  %vm3707_vm5 = vcmask 195712  }
 0xcd5   :  { %v3627_v49 = vadd.f32 %v5476_v38, %v3536_v13  ;;  %v3631_v51 = vadd.f32 %v5476_v38, %v3548_v48  ;;  %vm3714_vm6 = vcmask 261312   ;;  %vm3849_vm7 = vcmask 1041409  }
 0xcd6   :  { %v3690_v33 = vand.u32 127, %v3689_v60  ;;  %v3692_v4 = vshrl.u32 %v3689_v60, 7  ;;  %vm3851_vm8 = vcmask 1042434   ;;  %vm3853_vm9 = vcmask 1043459  }
 0xcd7   :  { %vm3855_vm10 = vcmask 1044484   ;;  %vm3857_vm11 = vcmask 1045509   ;;  %vm3859_vm12 = vcmask 1046534   ;;  %vm3861_vm13 = vcmask 1047559  }
 0xcd8   :  { %v3530_v16 = vpop.xlane.xlu0 %3529  ;;  %v3542_v17 = vpop.xlane.xlu1 %3541  ;;  %v3695_v32 = vadd.s32 4294967288, %v3690_v33  ;;  %v3702_v43 = vadd.s32 4294967280, %v3690_v33  ;;  %v5482_v37 = vsub.s32 %v3690_v33, %v3692_v4  ;;  %v3709_v41 = vadd.s32 4294967272, %v3690_v33 }
 0xcd9   :  { %v3625_v45 = vadd.f32 %v5476_v38, %v3530_v16  ;;  %v3629_v47 = vadd.f32 %v5476_v38, %v3542_v17 }
 0xcda   :  { %v5478_v39 = vsub.s32 %v3695_v32, %v3692_v4  ;;  %v5487_v54 = vsub.s32 %v3702_v43, %v3692_v4  ;;  %v5494_v56 = vsub.s32 %v3709_v41, %v3692_v4 }
 0xcdb   :  { %v3694_v50 = vrot.slane %v3625_v45, %v5482_v37  ;;  %v3719_v6 = vrot.slane %v3629_v47, %v5482_v37 }
 0xcdc   :  { %v3539_v18 = vpop.xlane.xlu0 %3538  ;;  %v3551_v3 = vpop.xlane.xlu1 %3550  ;;  %v3706_v58 = vrot.slane %v3627_v49, %v5487_v54  ;;  %v3728_v34 = vrot.slane %v3631_v51, %v5487_v54 }
 0xcdd   :  { %v3628_v57 = vadd.f32 %v5476_v38, %v3539_v18  ;;  %v3632_v10 = vadd.f32 %v5476_v38, %v3551_v3 }
 0xcdf   :  { %v3713_v1 = vrot.slane %v3628_v57, %v5494_v56  ;;  %v3733_v12 = vrot.slane %v3632_v10, %v5494_v56 }
 0xce0   :  { %v3533_v8 = vpop.xlane.xlu0 %3532  ;;  %v3545_v14 = vpop.xlane.xlu1 %3544 }
 0xce1   :  { %v3626_v40 = vadd.f32 %v5476_v38, %v3533_v8  ;;  %v3630_v44 = vadd.f32 %v5476_v38, %v3545_v14 }
 0xce3   :  { %v3699_v53 = vrot.slane %v3626_v40, %v5478_v39  ;;  %v3723_v27 = vrot.slane %v3630_v44, %v5478_v39 }
 0xce4   :  { %v3560_v19 = vpop.xlane.xlu0 %3559  ;;  %v3563_v20 = vpop.xlane.xlu1 %3562 }
 0xce5   :  { %v3701_v59 = vsel %vm3700_vm4, %v3699_v53, %v3694_v50  ;;  %v3724_v61 = vsel %vm3700_vm4, %v3723_v27, %v3719_v6  ;;  %v3635_v7 = vadd.f32 %v5476_v38, %v3560_v19  ;;  %v3636_v15 = vadd.f32 %v5476_v38, %v3563_v20 }
 0xce6   :  { %v3708_v11 = vsel %vm3707_vm5, %v3706_v58, %v3701_v59  ;;  %v3729_v5 = vsel %vm3707_vm5, %v3728_v34, %v3724_v61 }
 0xce7   :  { %v3715_v16 = vsel %vm3714_vm6, %v3713_v1, %v3708_v11  ;;  %v3734_v3 = vsel %vm3714_vm6, %v3733_v12, %v3729_v5  ;;  %v3747_v20 = vrot.slane %v3635_v7, %v5487_v54  ;;  %v3752_v60 = vrot.slane %v3636_v15, %v5494_v56 }
 0xce8   :  { %v3554_v21 = vpop.xlane.xlu0 %3553  ;;  %v3557_v22 = vpop.xlane.xlu1 %3556  ;;  %v3850_v12 = vsel %vm3849_vm7, %v3734_v3, %v3715_v16 }
 0xce9   :  { %v3634_v62 = vadd.f32 %v5476_v38, %v3557_v22  ;;  %v3633_v0 = vadd.f32 %v5476_v38, %v3554_v21 }
 0xceb   :  { %v3742_v13 = vrot.slane %v3634_v62, %v5478_v39  ;;  %v3738_v8 = vrot.slane %v3633_v0, %v5482_v37 }
 0xcec   :  { %v5463_v23 = vpop.xlane.xlu0 %3571  ;;  %v3566_v25 = vpop.xlane.xlu1 %3565 }
 0xced   :  { %v3637_v9 = vadd.f32 %v5476_v38, %v3566_v25  ;;  %v3639_v21 = vadd.f32 %v5476_v38, %v5463_v23 }
 0xcef   :  { %v3757_v22 = vrot.slane %v3637_v9, %v5482_v37 }
 0xcf0   :  { %v3569_v24 = vpop.xlane.xlu0 %3568  ;;  %v5465_v28 = vpop.xlane.xlu1 %3574 }
 0xcf1   :  { %v3638_v63 = vadd.f32 %v5476_v38, %v3569_v24  ;;  %v3640_v23 = vadd.f32 %v5476_v38, %v5465_v28 }
 0xcf3   :  { %v3761_v17 = vrot.slane %v3638_v63, %v5478_v39  ;;  %v3771_v50 = vrot.slane %v3640_v23, %v5494_v56 }
 0xcf4   :  { %v5467_v29 = vpop.xlane.xlu0 %3583  ;;  %v3578_v30 = vpop.xlane.xlu1 %3577 }
 0xcf5   :  { %v3641_v14 = vadd.f32 %v5476_v38, %v3578_v30  ;;  %v3762_v32 = vsel %vm3700_vm4, %v3761_v17, %v3757_v22  ;;  %v3643_v4 = vadd.f32 %v5476_v38, %v5467_v29 }
 0xcf7   :  { %v3785_v51 = vrot.slane %v3643_v4, %v5487_v54 }
 0xcf8   :  { %v3581_v31 = vpop.xlane.xlu0 %3580  ;;  %v5469_v35 = vpop.xlane.xlu1 %3586 }
 0xcf9   :  { %v3642_v48 = vadd.f32 %v5476_v38, %v3581_v31  ;;  %v3743_v31 = vsel %vm3700_vm4, %v3742_v13, %v3738_v8  ;;  %v3644_v43 = vadd.f32 %v5476_v38, %v5469_v35 }
 0xcfa   :  { %v3748_v53 = vsel %vm3707_vm5, %v3747_v20, %v3743_v31 }
 0xcfb   :  { %v3780_v30 = vrot.slane %v3642_v48, %v5478_v39 }
 0xd12   :  { %v5471_v36 = vpop.xlane.xlu0 %3595 }
 0xd13   :  { %v3590_v42 = vpop.xlane.xlu1 %3589  ;;  %v3647_v44 = vadd.f32 %v5476_v38, %v5471_v36 }
 0xd14   :  { %v3645_v25 = vadd.f32 %v5476_v38, %v3590_v42  ;;  %v3776_v42 = vrot.slane %v3641_v14, %v5482_v37 }
 0xd15   :  { %v3804_v57 = vrot.slane %v3647_v44, %v5487_v54 }
 0xd16   :  { %v3593_v46 = vpop.xlane.xlu0 %3592  ;;  %v3795_v47 = vrot.slane %v3645_v25, %v5482_v37  ;;  %v3781_v49 = vsel %vm3700_vm4, %v3780_v30, %v3776_v42 }
 0xd17   :  { %v3599_v52 = vpop.xlane.xlu1 %3598  ;;  %v3646_v18 = vadd.f32 %v5476_v38, %v3593_v46  ;;  %v3766_v46 = vrot.slane %v3639_v21, %v5487_v54  ;;  %v3786_v10 = vsel %vm3707_vm5, %v3785_v51, %v3781_v49 }
 0xd18   :  { %v3648_v28 = vadd.f32 %v5476_v38, %v3599_v52 }
 0xd19   :  { %v3799_v40 = vrot.slane %v3646_v18, %v5478_v39  ;;  %v3767_v36 = vsel %vm3707_vm5, %v3766_v46, %v3762_v32 }
 0xd1a   :  { %v3809_v61 = vrot.slane %v3648_v28, %v5494_v56  ;;  %v3772_v1 = vsel %vm3714_vm6, %v3771_v50, %v3767_v36 }
 0xd1b   :  { %v3800_v6 = vsel %vm3700_vm4, %v3799_v40, %v3795_v47 }
 0xd1c   :  { %v3805_v11 = vsel %vm3707_vm5, %v3804_v57, %v3800_v6 }
 0xd1d   :  { %v3810_v17 = vsel %vm3714_vm6, %v3809_v61, %v3805_v11 }
 0xd32   :  { %v3608_v55 = vpop.xlane.xlu0 %3607 }
 0xd33   :  { %v3602_v2 = vpop.xlane.xlu1 %3601  ;;  %v3651_v29 = vadd.f32 %v5476_v38, %v3608_v55  ;;  %v3790_v55 = vrot.slane %v3644_v43, %v5494_v56 }
 0xd34   :  { %v3649_v33 = vadd.f32 %v5476_v38, %v3602_v2  ;;  %v3753_v2 = vsel %vm3714_vm6, %v3752_v60, %v3748_v53 }
 0xd35   :  { %v3823_v62 = vrot.slane %v3651_v29, %v5487_v54  ;;  %v3791_v15 = vsel %vm3714_vm6, %v3790_v55, %v3786_v10  ;;  %v3852_v48 = vsel %vm3851_vm8, %v3753_v2, %v3850_v12 }
 0xd36   :  { %v3605_v26 = vpop.xlane.xlu0 %3604  ;;  %v3814_v35 = vrot.slane %v3649_v33, %v5482_v37  ;;  %v3854_v8 = vsel %vm3853_vm9, %v3772_v1, %v3852_v48 }
 0xd37   :  { %v3650_v19 = vadd.f32 %v5476_v38, %v3605_v26  ;;  %v3611_v24 = vpop.xlane.xlu1 %3610  ;;  %v3856_v16 = vsel %vm3855_vm10, %v3791_v15, %v3854_v8 }
 0xd38   :  { %v3652_v27 = vadd.f32 %v5476_v38, %v3611_v24 }
 0xd39   :  { %v3818_v45 = vrot.slane %v3650_v19, %v5478_v39 }
 0xd3a   :  { %v3828_v0 = vrot.slane %v3652_v27, %v5494_v56 }
 0xd3b   :  { %v3819_v59 = vsel %vm3700_vm4, %v3818_v45, %v3814_v35 }
 0xd3c   :  { %v3824_v5 = vsel %vm3707_vm5, %v3823_v62, %v3819_v59 }
 0xd53   :  { %v3614_v41 = vpop.xlane.xlu1 %3613 }
 0xd54   :  { %v3653_v34 = vadd.f32 %v5476_v38, %v3614_v41 }
 0xd55   :  { %v3617_v52 = vpop.xlane.xlu0 %3616 }
 0xd56   :  { %v3654_v58 = vadd.f32 %v5476_v38, %v3617_v52  ;;  %v3833_v18 = vrot.slane %v3653_v34, %v5482_v37 }
 0xd57   :  { %v3623_v63 = vpop.xlane.xlu1 %3622 }
 0xd58   :  { %v3837_v7 = vrot.slane %v3654_v58, %v5478_v39  ;;  %v3656_v9 = vadd.f32 %v5476_v38, %v3623_v63  ;;  %v3829_v39 = vsel %vm3714_vm6, %v3828_v0, %v3824_v5 }
 0xd59   :  { %v3620_v26 = vpop.xlane.xlu0 %3619 }
 0xd5a   :  { %v3655_v13 = vadd.f32 %v5476_v38, %v3620_v26  ;;  %v3838_v3 = vsel %vm3700_vm4, %v3837_v7, %v3833_v18  ;;  %v3847_v19 = vrot.slane %v3656_v9, %v5494_v56  ;;  %v3858_v38 = vsel %vm3857_vm11, %v3810_v17, %v3856_v16 }
 0xd5b   :  { %v3860_v21 = vsel %vm3859_vm12, %v3829_v39, %v3858_v38 }
 0xd5c   :  { %v3842_v14 = vrot.slane %v3655_v13, %v5487_v54 }
 0xd5e   :  { %v3843_v20 = vsel %vm3707_vm5, %v3842_v14, %v3838_v3 }
 0xd5f   :  { %v3848_v22 = vsel %vm3714_vm6, %v3847_v19, %v3843_v20 }
 0xd60   :  { %v3862_v37 = vsel %vm3861_vm13, %v3848_v22, %v3860_v21 }
 0xd61   :  { %v3864_v25 = vsel %vm461_vm3, %v3862_v37, 0.0 }
 0xd62   :  { %3865 = vst [vmem:[%s5595_s9] sm:$0xff] %v3864_v25 }
 0xd63   :  { %4766 = dma.done.wait [#allocation4], 128  }
 0xd64   :  { %4767 = vsyncadd [#allocation4], 4294967168 }
 0xd65   :  { %3883 = vsyncpa [#allocation4], 1 }

</bundles_post_ra>
